<compile_context>
chip_gen: v6e
topology: v6e:2x2x1
jax: 0.10.0
libtpu: 0.0.40
codegen_flags: <defaults>
</compile_context>

<pallas_src>
import jax
import jax.numpy as jnp
from jax.experimental import pallas as pl
from jax.experimental.pallas import tpu as pltpu


_LANES = 512          # lane-dense width for the elementwise kernels
_MAX_ROW_TILE = 256   # rows per grid step for the elementwise kernels


def _lane_iota():
    return jax.lax.broadcasted_iota(jnp.int32, (1, 128), 1)


# ---------------------------------------------------------------------------
# Elementwise kernels (focal heatmap loss, depth L1) -- lane-dense + tiled
# ---------------------------------------------------------------------------

def _focal_kernel(x_ref, gt_ref, out_ref):
    """Per-tile partial sums of the penalty-reduced (CenterNet) focal loss.

    Single-log formulation: pos (gt==1) and neg (gt<1) are disjoint, so select
    the probability and the weight first and take ONE log per element
    (EUP work: sigmoid + 1 log instead of sigmoid + 2 logs).
    Padding elements carry gt == 2.0 -> pos = neg = False -> zero weight.
    """
    x = x_ref[...].astype(jnp.float32)
    gt = gt_ref[...].astype(jnp.float32)
    pred = jnp.clip(jax.nn.sigmoid(x), 1e-4, 1.0 - 1e-4)     # _sigmoid
    # NOTE: gt == 1.0 float equality assumes CenterNet GT heatmaps write peaks
    # as exactly 1.0 (true for the standard target generator).
    pos = gt == 1.0
    neg = gt < 1.0
    posf = pos.astype(jnp.float32)
    negf = neg.astype(jnp.float32)
    p_sel = jnp.where(pos, pred, 1.0 - pred)
    w = jnp.where(pos, (1.0 - pred) ** 2, (pred * pred) * (1.0 - gt) ** 4 * negf)
    loss_elem = jnp.log(p_sel) * w          # = pos_loss + neg_loss per element
    total = jnp.sum(loss_elem)
    pos_part = jnp.sum(loss_elem * posf)
    npos = jnp.sum(posf)
    lane = _lane_iota()
    out_ref[...] = (jnp.where(lane == 0, total, 0.0)
                    + jnp.where(lane == 1, pos_part, 0.0)
                    + jnp.where(lane == 2, npos, 0.0))


def _l1_sum_kernel(a_ref, b_ref, out_ref):
    s = jnp.sum(jnp.abs(a_ref[...].astype(jnp.float32)
                        - b_ref[...].astype(jnp.float32)))
    lane = _lane_iota()
    out_ref[...] = jnp.where(lane == 0, s, 0.0)


def _elementwise_partials(kernel, a, b, pad_a, pad_b):
    """Flatten a/b to a lane-dense (rows, 512) layout, tile rows over a
    parallel grid, return the summed (128,) lane-partials."""
    n = a.size
    rows = -(-n // _LANES)
    row_tile = min(_MAX_ROW_TILE, -(-rows // 8) * 8)
    rows_p = -(-rows // row_tile) * row_tile
    total = rows_p * _LANES
    af = a.reshape(-1)
    bf = b.reshape(-1)
    if total > n:
        af = jnp.pad(af, (0, total - n), constant_values=pad_a)
        bf = jnp.pad(bf, (0, total - n), constant_values=pad_b)
    a2 = af.reshape(rows_p, _LANES)
    b2 = bf.reshape(rows_p, _LANES)
    ntiles = rows_p // row_tile
    sums = pl.pallas_call(
        kernel,
        out_shape=jax.ShapeDtypeStruct((ntiles, 1, 128), jnp.float32),
        grid=(ntiles,),
        in_specs=[pl.BlockSpec((row_tile, _LANES), lambda i: (i, 0)),
                  pl.BlockSpec((row_tile, _LANES), lambda i: (i, 0))],
        out_specs=pl.BlockSpec((None, 1, 128), lambda i: (i, 0, 0)),
        compiler_params=pltpu.CompilerParams(dimension_semantics=("parallel",)),
    )(a2, b2)
    return jnp.sum(sums[:, 0, :], axis=0)


def focal_loss(hm_logits, hm_gt):
    part = _elementwise_partials(_focal_kernel, hm_logits, hm_gt, 0.0, 2.0)
    total, pos_part, npos = part[0], part[1], part[2]
    neg_sum = total - pos_part
    return jnp.where(npos > 0, -total / jnp.maximum(npos, 1.0), -neg_sum)


def l1_mean_loss(pred, target):
    part = _elementwise_partials(_l1_sum_kernel, pred, target, 0.0, 0.0)
    return part[0] / float(pred.size)


# ---------------------------------------------------------------------------
# Fused gather-based losses (RegL1 x4, CrossEntropy x3)
# ---------------------------------------------------------------------------

def _make_fused_reg_l1_kernel(n_heads):
    def kernel(ind_ref, mask_ref, *refs):
        feat_refs = refs[:n_heads]
        tgt_refs = refs[n_heads:2 * n_heads]
        out_ref = refs[-1]
        hw = feat_refs[0].shape[-1]
        k = ind_ref.shape[-1]
        # In-kernel one-hot of the gather indices: (HW, K).  Never hits HBM.
        hw_iota = jax.lax.broadcasted_iota(jnp.int32, (hw, k), 0)
        oh = (hw_iota == ind_ref[...]).astype(jnp.float32)
        mask = mask_ref[...].astype(jnp.float32)                      # (1, K)
        lane = _lane_iota()
        row = jnp.where(lane == n_heads, jnp.sum(mask), 0.0)
        for h in range(n_heads):
            feat = feat_refs[h][...].astype(jnp.float32)              # (C_h, HW)
            pred = jnp.dot(feat, oh, preferred_element_type=jnp.float32)  # (C_h, K)
            tgt = tgt_refs[h][...].astype(jnp.float32)                # (C_h, K)
            diff = jnp.abs(pred - tgt) * mask                         # mask is 0/1
            row = row + jnp.where(lane == h, jnp.sum(diff), 0.0)
        out_ref[...] = row
    return kernel


def fused_reg_l1_losses(heads, mask, ind):
    """heads: list of (out_nchw (B,C_h,H,W), target (B,K,C_h)).
    Returns one loss per head, matching CenterNet RegL1Loss:
      sum(|gather(out) - tgt| * mask) / (mask.sum() * C_h + 1e-4)
    (the denominator reproduces torch's mask.expand_as(pred).sum())."""
    n_heads = len(heads)
    B, _, H, W = heads[0][0].shape
    HW = H * W
    K = ind.shape[1]
    ind3 = ind.reshape(B, 1, K).astype(jnp.int32)
    mask3 = mask.reshape(B, 1, K).astype(jnp.float32)
    feats = [o.reshape(B, o.shape[1], HW) for o, _ in heads]   # free reshape, keeps dtype
    tgts = [jnp.transpose(t, (0, 2, 1)).astype(jnp.float32) for _, t in heads]  # tiny (B,C_h,K)
    in_specs = [pl.BlockSpec((None, 1, K), lambda b: (b, 0, 0)),
                pl.BlockSpec((None, 1, K), lambda b: (b, 0, 0))]
    in_specs += [pl.BlockSpec((None, f.shape[1], HW), lambda b: (b, 0, 0)) for f in feats]
    in_specs += [pl.BlockSpec((None, t.shape[1], K), lambda b: (b, 0, 0)) for t in tgts]
    sums = pl.pallas_call(
        _make_fused_reg_l1_kernel(n_heads),
        out_shape=jax.ShapeDtypeStruct((B, 1, 128), jnp.float32),
        grid=(B,),
        in_specs=in_specs,
        out_specs=pl.BlockSpec((None, 1, 128), lambda b: (b, 0, 0)),
        compiler_params=pltpu.CompilerParams(dimension_semantics=("parallel",)),
    )(ind3, mask3, *feats, *tgts)
    tot = jnp.sum(sums[:, 0, :], axis=0)                       # (128,)
    mask_total = tot[n_heads]
    return [tot[h] / (mask_total * float(heads[h][0].shape[1]) + 1e-4)
            for h in range(n_heads)]


def _make_fused_cross_kernel(slices):
    n_heads = len(slices)

    def kernel(ind_ref, mask_ref, feat_ref, tgt_oh_ref, out_ref):
        hw = feat_ref.shape[-1]
        k = ind_ref.shape[-1]
        hw_iota = jax.lax.broadcasted_iota(jnp.int32, (hw, k), 0)
        oh = (hw_iota == ind_ref[...]).astype(jnp.float32)            # (HW, K)
        feat = feat_ref[...].astype(jnp.float32)                      # (Ctot, HW)
        logits_all = jnp.dot(feat, oh, preferred_element_type=jnp.float32)  # (Ctot, K)
        tgt_oh = tgt_oh_ref[...].astype(jnp.float32)                  # (Ctot, K)
        mask = mask_ref[...].astype(jnp.float32)                      # (1, K)
        lane = _lane_iota()
        row = jnp.where(lane == n_heads, jnp.sum(mask), 0.0)
        for h, (start, size) in enumerate(slices):
            logits = logits_all[start:start + size, :]                # (n_cls, K)
            t_oh = tgt_oh[start:start + size, :]
            m = jnp.max(logits, axis=0, keepdims=True)                # (1, K)
            lse = m + jnp.log(jnp.sum(jnp.exp(logits - m), axis=0, keepdims=True))
            logit_t = jnp.sum(logits * t_oh, axis=0, keepdims=True)
            ce = (lse - logit_t) * mask
            row = row + jnp.where(lane == h, jnp.sum(ce), 0.0)
        out_ref[...] = row
    return kernel


def fused_cross_losses(kt_nchw, mask, ind, target_idx_list, slices):
    """Masked cross-entropy over the class-groups of kept_type, one launch.
    loss_h = sum(CE_h * mask) / (mask.sum() + 1e-4)."""
    B, Ctot, H, W = kt_nchw.shape
    HW = H * W
    K = ind.shape[1]
    feat = kt_nchw.reshape(B, Ctot, HW)                               # free reshape
    ind3 = ind.reshape(B, 1, K).astype(jnp.int32)
    mask3 = mask.reshape(B, 1, K).astype(jnp.float32)
    parts = []
    for (start, size), tgt_idx in zip(slices, target_idx_list):
        oh = jax.nn.one_hot(tgt_idx, size, dtype=jnp.float32)         # (B, K, size) tiny
        parts.append(jnp.transpose(oh, (0, 2, 1)))                    # (B, size, K)
    tgt_oh = jnp.concatenate(parts, axis=1)                           # (B, Ctot, K)
    sums = pl.pallas_call(
        _make_fused_cross_kernel(slices),
        out_shape=jax.ShapeDtypeStruct((B, 1, 128), jnp.float32),
        grid=(B,),
        in_specs=[
            pl.BlockSpec((None, 1, K), lambda b: (b, 0, 0)),
            pl.BlockSpec((None, 1, K), lambda b: (b, 0, 0)),
            pl.BlockSpec((None, Ctot, HW), lambda b: (b, 0, 0)),
            pl.BlockSpec((None, Ctot, K), lambda b: (b, 0, 0)),
        ],
        out_specs=pl.BlockSpec((None, 1, 128), lambda b: (b, 0, 0)),
        compiler_params=pltpu.CompilerParams(dimension_semantics=("parallel",)),
    )(ind3, mask3, feat, tgt_oh)
    tot = jnp.sum(sums[:, 0, :], axis=0)
    mask_total = tot[len(slices)]
    return [tot[h] / (mask_total + 1e-4) for h in range(len(slices))]


# ---------------------------------------------------------------------------
# StereoLoss forward (glue)
# ---------------------------------------------------------------------------

def compute_kept_label(kept, wh, grid_size):
    """Port of StereoLoss.computeKeptLabel (label preprocessing, plain JAX)."""
    assert wh.shape[2] == 3
    assert kept.shape[2] == 6
    width = (wh[:, :, 0] + 1.0)[:, :, None]                    # (B, K, 1)
    target = jnp.round(kept * grid_size / width)
    target = jnp.where(target < 0, -225.0, target)
    target = jnp.where(target > grid_size - 1, -225.0, target)
    kpts_pos = jnp.max(target[:, :, :4], axis=2)
    kpts_type = jnp.argmax(target[:, :, :4], axis=2).astype(jnp.float32)
    first = (kpts_type * grid_size + kpts_pos)[:, :, None]
    target = jnp.concatenate([first, target[:, :, 4:]], axis=2)
    target = jnp.where(target < 0, 0.0, target)
    return target.astype(jnp.int32)


def stereo_loss_forward(outputs, batch, opt, loss_weight):
    output = outputs[-1]
    g = opt["grid"]

    depth_loss = jnp.float32(0.0)
    if opt["cost_volume"]:
        depth_loss = l1_mean_loss(output["depth"], batch["depth"])

    # TODO(synk): opt.mse_loss == True path (MSELoss on sigmoided heatmap) not
    # implemented; the default / demo config uses FocalLoss.
    hm_loss = focal_loss(output["hm"], batch["hm"])

    # Four RegL1 heads fused into a single pallas_call (one gather per batch).
    dim_loss, orien_loss, wh_loss, off_loss = fused_reg_l1_losses(
        [(output["dim"], batch["dim"]),
         (output["orien"], batch["orien"]),
         (output["wh"], batch["wh"]),
         (output["reg"], batch["reg"])],
        batch["rot_mask"], batch["ind"])

    target = compute_kept_label(batch["kept"], batch["wh"], g)
    slices = ((0, 4 * g), (4 * g, g), (5 * g, g))
    kept_type_loss, border_left_loss, border_right_loss = fused_cross_losses(
        output["kept_type"], batch["rot_mask"], batch["ind"],
        [target[:, :, 0], target[:, :, 1], target[:, :, 2]], slices)
    kept_loss = (kept_type_loss + border_left_loss + border_right_loss) / 3.0

    lw = loss_weight
    if opt["uncert"]:
        loss = (hm_loss * jnp.exp(-lw[0]) + lw[0]
                + wh_loss * jnp.exp(-lw[1]) + lw[1]
                + off_loss * jnp.exp(-lw[2]) + lw[2]
                + depth_loss * jnp.exp(-lw[3]) + lw[3]
                + dim_loss * jnp.exp(-lw[4]) + lw[4]
                + orien_loss * jnp.exp(-lw[5]) + lw[5]
                + kept_loss * jnp.exp(-lw[6]) + lw[6])
    else:
        loss = (lw[0] * hm_loss + lw[1] * wh_loss + lw[2] * off_loss
                + lw[3] * depth_loss + lw[4] * dim_loss + lw[5] * orien_loss
                + lw[6] * kept_loss)

    loss_stats = {"loss": loss, "hm_loss": hm_loss, "wh_loss": wh_loss,
                  "off_loss": off_loss, "dim_loss": dim_loss,
                  "orien_loss": orien_loss, "kept_loss": kept_loss}
    if opt["cost_volume"]:
        loss_stats["depth_loss"] = depth_loss
    return loss, loss_stats


# ---------------------------------------------------------------------------
# Demo
# ---------------------------------------------------------------------------

if __name__ == "__main__":
    key = jax.random.PRNGKey(0)
    ks = jax.random.split(key, 20)

    B, K, H, W = 2, 8, 16, 16
    n_hm, grid = 3, 8
    opt = {"mse_loss": False, "cost_volume": True, "uncert": True, "grid": grid}

    # deterministic "parameter": per-task uncertainty log-variances (7 weights)
    loss_weight = jnp.linspace(-0.3, 0.3, 7).astype(jnp.float32)

    # network outputs (NCHW, raw logits / regressions)
    output = {
        "hm": jax.random.normal(ks[0], (B, n_hm, H, W), jnp.float32),
        "wh": jax.random.normal(ks[1], (B, 3, H, W), jnp.float32),
        "reg": jax.random.normal(ks[2], (B, 2, H, W), jnp.float32),
        "dim": jax.random.normal(ks[3], (B, 3, H, W), jnp.float32),
        "orien": jax.random.normal(ks[4], (B, 8, H, W), jnp.float32),
        "kept_type": jax.random.normal(ks[5], (B, 6 * grid, H, W), jnp.float32),
        "depth": jax.random.normal(ks[6], (B, 1, H, W), jnp.float32),
    }
    outputs = [output]

    hm_gt = jax.random.uniform(ks[7], (B, n_hm, H, W), jnp.float32) * 0.9
    hm_gt = hm_gt.at[:, :, 4, 4].set(1.0)

    rot_mask = (jax.random.uniform(ks[8], (B, K)) > 0.3).astype(jnp.float32)
    rot_mask = rot_mask.at[:, 0].set(1.0)

    batch = {
        "hm": hm_gt,
        "ind": jax.random.randint(ks[9], (B, K), 0, H * W, jnp.int32),
        "rot_mask": rot_mask,
        "dim": jax.random.normal(ks[10], (B, K, 3), jnp.float32),
        "orien": jax.random.normal(ks[11], (B, K, 8), jnp.float32),
        "wh": jax.random.uniform(ks[12], (B, K, 3), jnp.float32, 5.0, 20.0),
        "reg": jax.random.uniform(ks[13], (B, K, 2), jnp.float32),
        "kept": jax.random.uniform(ks[14], (B, K, 6), jnp.float32, 0.0, 25.0),
        "depth": jax.random.normal(ks[15], (B, 1, H, W), jnp.float32),
    }

    loss_fn = jax.jit(lambda outs, bat, lw: stereo_loss_forward(outs, bat, opt, lw))
    loss, loss_stats = loss_fn(outputs, batch, loss_weight)
    jax.block_until_ready(loss)
    jax.block_until_ready(loss_stats)
    print("KERNEL_OK")
</pallas_src>

<mosaic_0001>
module attributes {stable_mosaic.version = 11 : i64} {
  func.func @kernel(%arg0: i32, %arg1: memref<1x1x8xi32, #tpu.memory_space<vmem>>, %arg2: memref<1x1x8xf32, #tpu.memory_space<vmem>>, %arg3: memref<1x48x256xf32, #tpu.memory_space<vmem>>, %arg4: memref<1x48x8xf32, #tpu.memory_space<vmem>>, %arg5: memref<1x1x128xf32, #tpu.memory_space<vmem>>) attributes {dimension_semantics = [#tpu.dimension_semantics<parallel>], iteration_bounds = array<i64: 2>, scalar_prefetch = 0 : i64, scratch_operands = 0 : i64, tpu.core_type = #tpu.core_type<tc>, window_params = [{transform_indices = @transform_0, window_bounds = array<i64: 1, 1, 8>}, {transform_indices = @transform_1, window_bounds = array<i64: 1, 1, 8>}, {transform_indices = @transform_2, window_bounds = array<i64: 1, 48, 256>}, {transform_indices = @transform_3, window_bounds = array<i64: 1, 48, 8>}, {transform_indices = @transform_4, window_bounds = array<i64: 1, 1, 128>}]} {
    %0 = tpu.iota {dimensions = array<i32: 0>} : vector<256x8xi32>
    %c0 = arith.constant 0 : index
    %c0_0 = arith.constant 0 : index
    %c0_1 = arith.constant 0 : index
    %1 = vector.load %arg1[%c0, %c0_0, %c0_1] : memref<1x1x8xi32, #tpu.memory_space<vmem>>, vector<1x1x8xi32>
    %2 = vector.shape_cast %1 : vector<1x1x8xi32> to vector<1x8xi32>
    %3 = vector.broadcast %2 : vector<1x8xi32> to vector<256x8xi32>
    %4 = arith.cmpi eq, %0, %3 : vector<256x8xi32>
    %5 = arith.extui %4 : vector<256x8xi1> to vector<256x8xi32>
    %6 = arith.sitofp %5 : vector<256x8xi32> to vector<256x8xf32>
    %c0_2 = arith.constant 0 : index
    %c0_3 = arith.constant 0 : index
    %c0_4 = arith.constant 0 : index
    %7 = vector.load %arg3[%c0_2, %c0_3, %c0_4] : memref<1x48x256xf32, #tpu.memory_space<vmem>>, vector<1x48x256xf32>
    %8 = vector.shape_cast %7 : vector<1x48x256xf32> to vector<48x256xf32>
    %cst = arith.constant dense<0.000000e+00> : vector<48x8xf32>
    %9 = tpu.matmul %8, %6, %cst {dimension_numbers = #tpu.dot_dimension_numbers<[1], [0], [0], [1], [0, 0, 1, 1], [], []>} : vector<48x256xf32>, vector<256x8xf32>, vector<48x8xf32> -> vector<48x8xf32>
    %c0_5 = arith.constant 0 : index
    %c0_6 = arith.constant 0 : index
    %c0_7 = arith.constant 0 : index
    %10 = vector.load %arg4[%c0_5, %c0_6, %c0_7] : memref<1x48x8xf32, #tpu.memory_space<vmem>>, vector<1x48x8xf32>
    %11 = vector.shape_cast %10 : vector<1x48x8xf32> to vector<48x8xf32>
    %c0_8 = arith.constant 0 : index
    %c0_9 = arith.constant 0 : index
    %c0_10 = arith.constant 0 : index
    %12 = vector.load %arg2[%c0_8, %c0_9, %c0_10] : memref<1x1x8xf32, #tpu.memory_space<vmem>>, vector<1x1x8xf32>
    %13 = vector.shape_cast %12 : vector<1x1x8xf32> to vector<1x8xf32>
    %14 = tpu.iota {dimensions = array<i32: 1>} : vector<1x128xi32>
    %c3_i32 = arith.constant 3 : i32
    %15 = vector.broadcast %c3_i32 : i32 to vector<1x128xi32>
    %16 = arith.cmpi eq, %14, %15 : vector<1x128xi32>
    %17 = vector.shape_cast %13 : vector<1x8xf32> to vector<1x1x8xf32>
    %cst_11 = arith.constant dense<0.000000e+00> : vector<1xf32>
    %18 = vector.multi_reduction <add>, %17, %cst_11 [1, 2] : vector<1x1x8xf32> to vector<1xf32>
    %19 = vector.shape_cast %18 : vector<1xf32> to vector<1x1x1xf32>
    %20 = vector.extract %19[0, 0, 0] : f32 from vector<1x1x1xf32>
    %cst_12 = arith.constant 0.000000e+00 : f32
    %21 = vector.broadcast %20 : f32 to vector<1x128xf32>
    %22 = vector.broadcast %cst_12 : f32 to vector<1x128xf32>
    %23 = arith.select %16, %21, %22 : vector<1x128xi1>, vector<1x128xf32>
    %24 = vector.extract_strided_slice %9 {offsets = [0, 0], sizes = [32, 8], strides = [1, 1]} : vector<48x8xf32> to vector<32x8xf32>
    %25 = vector.extract_strided_slice %11 {offsets = [0, 0], sizes = [32, 8], strides = [1, 1]} : vector<48x8xf32> to vector<32x8xf32>
    %cst_13 = arith.constant dense<0xFF800000> : vector<8xf32>
    %26 = vector.multi_reduction <maximumf>, %24, %cst_13 [0] : vector<32x8xf32> to vector<8xf32>
    %27 = vector.shape_cast %26 : vector<8xf32> to vector<1x8xf32>
    %28 = vector.broadcast %27 : vector<1x8xf32> to vector<32x8xf32>
    %29 = arith.subf %24, %28 : vector<32x8xf32>
    %30 = math.exp %29 : vector<32x8xf32>
    %cst_14 = arith.constant dense<0.000000e+00> : vector<8xf32>
    %31 = vector.multi_reduction <add>, %30, %cst_14 [0] : vector<32x8xf32> to vector<8xf32>
    %32 = vector.shape_cast %31 : vector<8xf32> to vector<1x8xf32>
    %33 = math.log %32 : vector<1x8xf32>
    %34 = arith.addf %27, %33 : vector<1x8xf32>
    %35 = arith.mulf %24, %25 : vector<32x8xf32>
    %cst_15 = arith.constant dense<0.000000e+00> : vector<8xf32>
    %36 = vector.multi_reduction <add>, %35, %cst_15 [0] : vector<32x8xf32> to vector<8xf32>
    %37 = vector.shape_cast %36 : vector<8xf32> to vector<1x8xf32>
    %38 = arith.subf %34, %37 : vector<1x8xf32>
    %39 = arith.mulf %38, %13 : vector<1x8xf32>
    %c0_i32 = arith.constant 0 : i32
    %40 = vector.broadcast %c0_i32 : i32 to vector<1x128xi32>
    %41 = arith.cmpi eq, %14, %40 : vector<1x128xi32>
    %42 = vector.shape_cast %39 : vector<1x8xf32> to vector<1x1x8xf32>
    %cst_16 = arith.constant dense<0.000000e+00> : vector<1xf32>
    %43 = vector.multi_reduction <add>, %42, %cst_16 [1, 2] : vector<1x1x8xf32> to vector<1xf32>
    %44 = vector.shape_cast %43 : vector<1xf32> to vector<1x1x1xf32>
    %45 = vector.extract %44[0, 0, 0] : f32 from vector<1x1x1xf32>
    %cst_17 = arith.constant 0.000000e+00 : f32
    %46 = vector.broadcast %45 : f32 to vector<1x128xf32>
    %47 = vector.broadcast %cst_17 : f32 to vector<1x128xf32>
    %48 = arith.select %41, %46, %47 : vector<1x128xi1>, vector<1x128xf32>
    %49 = arith.addf %23, %48 : vector<1x128xf32>
    %50 = vector.extract_strided_slice %9 {offsets = [32, 0], sizes = [8, 8], strides = [1, 1]} : vector<48x8xf32> to vector<8x8xf32>
    %51 = vector.extract_strided_slice %11 {offsets = [32, 0], sizes = [8, 8], strides = [1, 1]} : vector<48x8xf32> to vector<8x8xf32>
    %cst_18 = arith.constant dense<0xFF800000> : vector<8xf32>
    %52 = vector.multi_reduction <maximumf>, %50, %cst_18 [0] : vector<8x8xf32> to vector<8xf32>
    %53 = vector.shape_cast %52 : vector<8xf32> to vector<1x8xf32>
    %54 = vector.broadcast %53 : vector<1x8xf32> to vector<8x8xf32>
    %55 = arith.subf %50, %54 : vector<8x8xf32>
    %56 = math.exp %55 : vector<8x8xf32>
    %cst_19 = arith.constant dense<0.000000e+00> : vector<8xf32>
    %57 = vector.multi_reduction <add>, %56, %cst_19 [0] : vector<8x8xf32> to vector<8xf32>
    %58 = vector.shape_cast %57 : vector<8xf32> to vector<1x8xf32>
    %59 = math.log %58 : vector<1x8xf32>
    %60 = arith.addf %53, %59 : vector<1x8xf32>
    %61 = arith.mulf %50, %51 : vector<8x8xf32>
    %cst_20 = arith.constant dense<0.000000e+00> : vector<8xf32>
    %62 = vector.multi_reduction <add>, %61, %cst_20 [0] : vector<8x8xf32> to vector<8xf32>
    %63 = vector.shape_cast %62 : vector<8xf32> to vector<1x8xf32>
    %64 = arith.subf %60, %63 : vector<1x8xf32>
    %65 = arith.mulf %64, %13 : vector<1x8xf32>
    %c1_i32 = arith.constant 1 : i32
    %66 = vector.broadcast %c1_i32 : i32 to vector<1x128xi32>
    %67 = arith.cmpi eq, %14, %66 : vector<1x128xi32>
    %68 = vector.shape_cast %65 : vector<1x8xf32> to vector<1x1x8xf32>
    %cst_21 = arith.constant dense<0.000000e+00> : vector<1xf32>
    %69 = vector.multi_reduction <add>, %68, %cst_21 [1, 2] : vector<1x1x8xf32> to vector<1xf32>
    %70 = vector.shape_cast %69 : vector<1xf32> to vector<1x1x1xf32>
    %71 = vector.extract %70[0, 0, 0] : f32 from vector<1x1x1xf32>
    %cst_22 = arith.constant 0.000000e+00 : f32
    %72 = vector.broadcast %71 : f32 to vector<1x128xf32>
    %73 = vector.broadcast %cst_22 : f32 to vector<1x128xf32>
    %74 = arith.select %67, %72, %73 : vector<1x128xi1>, vector<1x128xf32>
    %75 = arith.addf %49, %74 : vector<1x128xf32>
    %76 = vector.extract_strided_slice %9 {offsets = [40, 0], sizes = [8, 8], strides = [1, 1]} : vector<48x8xf32> to vector<8x8xf32>
    %77 = vector.extract_strided_slice %11 {offsets = [40, 0], sizes = [8, 8], strides = [1, 1]} : vector<48x8xf32> to vector<8x8xf32>
    %cst_23 = arith.constant dense<0xFF800000> : vector<8xf32>
    %78 = vector.multi_reduction <maximumf>, %76, %cst_23 [0] : vector<8x8xf32> to vector<8xf32>
    %79 = vector.shape_cast %78 : vector<8xf32> to vector<1x8xf32>
    %80 = vector.broadcast %79 : vector<1x8xf32> to vector<8x8xf32>
    %81 = arith.subf %76, %80 : vector<8x8xf32>
    %82 = math.exp %81 : vector<8x8xf32>
    %cst_24 = arith.constant dense<0.000000e+00> : vector<8xf32>
    %83 = vector.multi_reduction <add>, %82, %cst_24 [0] : vector<8x8xf32> to vector<8xf32>
    %84 = vector.shape_cast %83 : vector<8xf32> to vector<1x8xf32>
    %85 = math.log %84 : vector<1x8xf32>
    %86 = arith.addf %79, %85 : vector<1x8xf32>
    %87 = arith.mulf %76, %77 : vector<8x8xf32>
    %cst_25 = arith.constant dense<0.000000e+00> : vector<8xf32>
    %88 = vector.multi_reduction <add>, %87, %cst_25 [0] : vector<8x8xf32> to vector<8xf32>
    %89 = vector.shape_cast %88 : vector<8xf32> to vector<1x8xf32>
    %90 = arith.subf %86, %89 : vector<1x8xf32>
    %91 = arith.mulf %90, %13 : vector<1x8xf32>
    %c2_i32 = arith.constant 2 : i32
    %92 = vector.broadcast %c2_i32 : i32 to vector<1x128xi32>
    %93 = arith.cmpi eq, %14, %92 : vector<1x128xi32>
    %94 = vector.shape_cast %91 : vector<1x8xf32> to vector<1x1x8xf32>
    %cst_26 = arith.constant dense<0.000000e+00> : vector<1xf32>
    %95 = vector.multi_reduction <add>, %94, %cst_26 [1, 2] : vector<1x1x8xf32> to vector<1xf32>
    %96 = vector.shape_cast %95 : vector<1xf32> to vector<1x1x1xf32>
    %97 = vector.extract %96[0, 0, 0] : f32 from vector<1x1x1xf32>
    %cst_27 = arith.constant 0.000000e+00 : f32
    %98 = vector.broadcast %97 : f32 to vector<1x128xf32>
    %99 = vector.broadcast %cst_27 : f32 to vector<1x128xf32>
    %100 = arith.select %93, %98, %99 : vector<1x128xi1>, vector<1x128xf32>
    %101 = arith.addf %75, %100 : vector<1x128xf32>
    %c0_28 = arith.constant 0 : index
    %c0_29 = arith.constant 0 : index
    %c0_30 = arith.constant 0 : index
    %102 = vector.load %arg5[%c0_28, %c0_29, %c0_30] : memref<1x1x128xf32, #tpu.memory_space<vmem>>, vector<1x1x128xf32>
    %103 = vector.shape_cast %102 : vector<1x1x128xf32> to vector<1x128xf32>
    %104 = vector.shape_cast %101 : vector<1x128xf32> to vector<1x1x128xf32>
    tpu.vector_store %arg5[%c0_28, %c0_29, %c0_30], %104 {strides = array<i32>} : memref<1x1x128xf32, #tpu.memory_space<vmem>>, vector<1x1x128xf32>,
    return
  }
  func.func @transform_0(%arg0: i32) -> (i32, i32, i32) {
    %c0_i32 = arith.constant 0 : i32
    %c0_i32_0 = arith.constant 0 : i32
    %c0_i32_1 = arith.constant 0 : i32
    return %arg0, %c0_i32, %c0_i32_0 : i32, i32, i32
  }
  func.func @transform_1(%arg0: i32) -> (i32, i32, i32) {
    %c0_i32 = arith.constant 0 : i32
    %c0_i32_0 = arith.constant 0 : i32
    %c0_i32_1 = arith.constant 0 : i32
    return %arg0, %c0_i32, %c0_i32_0 : i32, i32, i32
  }
  func.func @transform_2(%arg0: i32) -> (i32, i32, i32) {
    %c0_i32 = arith.constant 0 : i32
    %c0_i32_0 = arith.constant 0 : i32
    %c0_i32_1 = arith.constant 0 : i32
    return %arg0, %c0_i32, %c0_i32_0 : i32, i32, i32
  }
  func.func @transform_3(%arg0: i32) -> (i32, i32, i32) {
    %c0_i32 = arith.constant 0 : i32
    %c0_i32_0 = arith.constant 0 : i32
    %c0_i32_1 = arith.constant 0 : i32
    return %arg0, %c0_i32, %c0_i32_0 : i32, i32, i32
  }
  func.func @transform_4(%arg0: i32) -> (i32, i32, i32) {
    %c0_i32 = arith.constant 0 : i32
    %c0_i32_0 = arith.constant 0 : i32
    %c0_i32_1 = arith.constant 0 : i32
    return %arg0, %c0_i32, %c0_i32_0 : i32, i32, i32
  }
}

module attributes {stable_mosaic.version = 11 : i64} {
  func.func @kernel(%arg0: i32, %arg1: memref<1x1x8xi32, #tpu.memory_space<vmem>>, %arg2: memref<1x1x8xf32, #tpu.memory_space<vmem>>, %arg3: memref<1x3x256xf32, #tpu.memory_space<vmem>>, %arg4: memref<1x8x256xf32, #tpu.memory_space<vmem>>, %arg5: memref<1x3x256xf32, #tpu.memory_space<vmem>>, %arg6: memref<1x2x256xf32, #tpu.memory_space<vmem>>, %arg7: memref<1x3x8xf32, #tpu.memory_space<vmem>>, %arg8: memref<1x8x8xf32, #tpu.memory_space<vmem>>, %arg9: memref<1x3x8xf32, #tpu.memory_space<vmem>>, %arg10: memref<1x2x8xf32, #tpu.memory_space<vmem>>, %arg11: memref<1x1x128xf32, #tpu.memory_space<vmem>>) attributes {dimension_semantics = [#tpu.dimension_semantics<parallel>], iteration_bounds = array<i64: 2>, scalar_prefetch = 0 : i64, scratch_operands = 0 : i64, tpu.core_type = #tpu.core_type<tc>, window_params = [{transform_indices = @transform_0, window_bounds = array<i64: 1, 1, 8>}, {transform_indices = @transform_1, window_bounds = array<i64: 1, 1, 8>}, {transform_indices = @transform_2, window_bounds = array<i64: 1, 3, 256>}, {transform_indices = @transform_3, window_bounds = array<i64: 1, 8, 256>}, {transform_indices = @transform_4, window_bounds = array<i64: 1, 3, 256>}, {transform_indices = @transform_5, window_bounds = array<i64: 1, 2, 256>}, {transform_indices = @transform_6, window_bounds = array<i64: 1, 3, 8>}, {transform_indices = @transform_7, window_bounds = array<i64: 1, 8, 8>}, {transform_indices = @transform_8, window_bounds = array<i64: 1, 3, 8>}, {transform_indices = @transform_9, window_bounds = array<i64: 1, 2, 8>}, {transform_indices = @transform_10, window_bounds = array<i64: 1, 1, 128>}]} {
    %0 = tpu.iota {dimensions = array<i32: 0>} : vector<256x8xi32>
    %c0 = arith.constant 0 : index
    %c0_0 = arith.constant 0 : index
    %c0_1 = arith.constant 0 : index
    %1 = vector.load %arg1[%c0, %c0_0, %c0_1] : memref<1x1x8xi32, #tpu.memory_space<vmem>>, vector<1x1x8xi32>
    %2 = vector.shape_cast %1 : vector<1x1x8xi32> to vector<1x8xi32>
    %3 = vector.broadcast %2 : vector<1x8xi32> to vector<256x8xi32>
    %4 = arith.cmpi eq, %0, %3 : vector<256x8xi32>
    %5 = arith.extui %4 : vector<256x8xi1> to vector<256x8xi32>
    %6 = arith.sitofp %5 : vector<256x8xi32> to vector<256x8xf32>
    %c0_2 = arith.constant 0 : index
    %c0_3 = arith.constant 0 : index
    %c0_4 = arith.constant 0 : index
    %7 = vector.load %arg2[%c0_2, %c0_3, %c0_4] : memref<1x1x8xf32, #tpu.memory_space<vmem>>, vector<1x1x8xf32>
    %8 = vector.shape_cast %7 : vector<1x1x8xf32> to vector<1x8xf32>
    %9 = tpu.iota {dimensions = array<i32: 1>} : vector<1x128xi32>
    %c4_i32 = arith.constant 4 : i32
    %10 = vector.broadcast %c4_i32 : i32 to vector<1x128xi32>
    %11 = arith.cmpi eq, %9, %10 : vector<1x128xi32>
    %12 = vector.shape_cast %8 : vector<1x8xf32> to vector<1x1x8xf32>
    %cst = arith.constant dense<0.000000e+00> : vector<1xf32>
    %13 = vector.multi_reduction <add>, %12, %cst [1, 2] : vector<1x1x8xf32> to vector<1xf32>
    %14 = vector.shape_cast %13 : vector<1xf32> to vector<1x1x1xf32>
    %15 = vector.extract %14[0, 0, 0] : f32 from vector<1x1x1xf32>
    %cst_5 = arith.constant 0.000000e+00 : f32
    %16 = vector.broadcast %15 : f32 to vector<1x128xf32>
    %17 = vector.broadcast %cst_5 : f32 to vector<1x128xf32>
    %18 = arith.select %11, %16, %17 : vector<1x128xi1>, vector<1x128xf32>
    %c0_6 = arith.constant 0 : index
    %c0_7 = arith.constant 0 : index
    %c0_8 = arith.constant 0 : index
    %19 = vector.load %arg3[%c0_6, %c0_7, %c0_8] : memref<1x3x256xf32, #tpu.memory_space<vmem>>, vector<1x3x256xf32>
    %20 = vector.shape_cast %19 : vector<1x3x256xf32> to vector<3x256xf32>
    %cst_9 = arith.constant dense<0.000000e+00> : vector<3x8xf32>
    %21 = tpu.matmul %20, %6, %cst_9 {dimension_numbers = #tpu.dot_dimension_numbers<[1], [0], [0], [1], [0, 0, 1, 1], [], []>} : vector<3x256xf32>, vector<256x8xf32>, vector<3x8xf32> -> vector<3x8xf32>
    %c0_10 = arith.constant 0 : index
    %c0_11 = arith.constant 0 : index
    %c0_12 = arith.constant 0 : index
    %22 = vector.load %arg7[%c0_10, %c0_11, %c0_12] : memref<1x3x8xf32, #tpu.memory_space<vmem>>, vector<1x3x8xf32>
    %23 = vector.shape_cast %22 : vector<1x3x8xf32> to vector<3x8xf32>
    %24 = arith.subf %21, %23 : vector<3x8xf32>
    %25 = math.absf %24 : vector<3x8xf32>
    %26 = vector.broadcast %8 : vector<1x8xf32> to vector<3x8xf32>
    %27 = arith.mulf %25, %26 : vector<3x8xf32>
    %c0_i32 = arith.constant 0 : i32
    %28 = vector.broadcast %c0_i32 : i32 to vector<1x128xi32>
    %29 = arith.cmpi eq, %9, %28 : vector<1x128xi32>
    %30 = vector.shape_cast %27 : vector<3x8xf32> to vector<1x3x8xf32>
    %cst_13 = arith.constant dense<0.000000e+00> : vector<1xf32>
    %31 = vector.multi_reduction <add>, %30, %cst_13 [1, 2] : vector<1x3x8xf32> to vector<1xf32>
    %32 = vector.shape_cast %31 : vector<1xf32> to vector<1x1x1xf32>
    %33 = vector.extract %32[0, 0, 0] : f32 from vector<1x1x1xf32>
    %cst_14 = arith.constant 0.000000e+00 : f32
    %34 = vector.broadcast %33 : f32 to vector<1x128xf32>
    %35 = vector.broadcast %cst_14 : f32 to vector<1x128xf32>
    %36 = arith.select %29, %34, %35 : vector<1x128xi1>, vector<1x128xf32>
    %37 = arith.addf %18, %36 : vector<1x128xf32>
    %c0_15 = arith.constant 0 : index
    %c0_16 = arith.constant 0 : index
    %c0_17 = arith.constant 0 : index
    %38 = vector.load %arg4[%c0_15, %c0_16, %c0_17] : memref<1x8x256xf32, #tpu.memory_space<vmem>>, vector<1x8x256xf32>
    %39 = vector.shape_cast %38 : vector<1x8x256xf32> to vector<8x256xf32>
    %cst_18 = arith.constant dense<0.000000e+00> : vector<8x8xf32>
    %40 = tpu.matmul %39, %6, %cst_18 {dimension_numbers = #tpu.dot_dimension_numbers<[1], [0], [0], [1], [0, 0, 1, 1], [], []>} : vector<8x256xf32>, vector<256x8xf32>, vector<8x8xf32> -> vector<8x8xf32>
    %c0_19 = arith.constant 0 : index
    %c0_20 = arith.constant 0 : index
    %c0_21 = arith.constant 0 : index
    %41 = vector.load %arg8[%c0_19, %c0_20, %c0_21] : memref<1x8x8xf32, #tpu.memory_space<vmem>>, vector<1x8x8xf32>
    %42 = vector.shape_cast %41 : vector<1x8x8xf32> to vector<8x8xf32>
    %43 = arith.subf %40, %42 : vector<8x8xf32>
    %44 = math.absf %43 : vector<8x8xf32>
    %45 = vector.broadcast %8 : vector<1x8xf32> to vector<8x8xf32>
    %46 = arith.mulf %44, %45 : vector<8x8xf32>
    %c1_i32 = arith.constant 1 : i32
    %47 = vector.broadcast %c1_i32 : i32 to vector<1x128xi32>
    %48 = arith.cmpi eq, %9, %47 : vector<1x128xi32>
    %49 = vector.shape_cast %46 : vector<8x8xf32> to vector<1x8x8xf32>
    %cst_22 = arith.constant dense<0.000000e+00> : vector<1xf32>
    %50 = vector.multi_reduction <add>, %49, %cst_22 [1, 2] : vector<1x8x8xf32> to vector<1xf32>
    %51 = vector.shape_cast %50 : vector<1xf32> to vector<1x1x1xf32>
    %52 = vector.extract %51[0, 0, 0] : f32 from vector<1x1x1xf32>
    %cst_23 = arith.constant 0.000000e+00 : f32
    %53 = vector.broadcast %52 : f32 to vector<1x128xf32>
    %54 = vector.broadcast %cst_23 : f32 to vector<1x128xf32>
    %55 = arith.select %48, %53, %54 : vector<1x128xi1>, vector<1x128xf32>
    %56 = arith.addf %37, %55 : vector<1x128xf32>
    %c0_24 = arith.constant 0 : index
    %c0_25 = arith.constant 0 : index
    %c0_26 = arith.constant 0 : index
    %57 = vector.load %arg5[%c0_24, %c0_25, %c0_26] : memref<1x3x256xf32, #tpu.memory_space<vmem>>, vector<1x3x256xf32>
    %58 = vector.shape_cast %57 : vector<1x3x256xf32> to vector<3x256xf32>
    %cst_27 = arith.constant dense<0.000000e+00> : vector<3x8xf32>
    %59 = tpu.matmul %58, %6, %cst_27 {dimension_numbers = #tpu.dot_dimension_numbers<[1], [0], [0], [1], [0, 0, 1, 1], [], []>} : vector<3x256xf32>, vector<256x8xf32>, vector<3x8xf32> -> vector<3x8xf32>
    %c0_28 = arith.constant 0 : index
    %c0_29 = arith.constant 0 : index
    %c0_30 = arith.constant 0 : index
    %60 = vector.load %arg9[%c0_28, %c0_29, %c0_30] : memref<1x3x8xf32, #tpu.memory_space<vmem>>, vector<1x3x8xf32>
    %61 = vector.shape_cast %60 : vector<1x3x8xf32> to vector<3x8xf32>
    %62 = arith.subf %59, %61 : vector<3x8xf32>
    %63 = math.absf %62 : vector<3x8xf32>
    %64 = vector.broadcast %8 : vector<1x8xf32> to vector<3x8xf32>
    %65 = arith.mulf %63, %64 : vector<3x8xf32>
    %c2_i32 = arith.constant 2 : i32
    %66 = vector.broadcast %c2_i32 : i32 to vector<1x128xi32>
    %67 = arith.cmpi eq, %9, %66 : vector<1x128xi32>
    %68 = vector.shape_cast %65 : vector<3x8xf32> to vector<1x3x8xf32>
    %cst_31 = arith.constant dense<0.000000e+00> : vector<1xf32>
    %69 = vector.multi_reduction <add>, %68, %cst_31 [1, 2] : vector<1x3x8xf32> to vector<1xf32>
    %70 = vector.shape_cast %69 : vector<1xf32> to vector<1x1x1xf32>
    %71 = vector.extract %70[0, 0, 0] : f32 from vector<1x1x1xf32>
    %cst_32 = arith.constant 0.000000e+00 : f32
    %72 = vector.broadcast %71 : f32 to vector<1x128xf32>
    %73 = vector.broadcast %cst_32 : f32 to vector<1x128xf32>
    %74 = arith.select %67, %72, %73 : vector<1x128xi1>, vector<1x128xf32>
    %75 = arith.addf %56, %74 : vector<1x128xf32>
    %c0_33 = arith.constant 0 : index
    %c0_34 = arith.constant 0 : index
    %c0_35 = arith.constant 0 : index
    %76 = vector.load %arg6[%c0_33, %c0_34, %c0_35] : memref<1x2x256xf32, #tpu.memory_space<vmem>>, vector<1x2x256xf32>
    %77 = vector.shape_cast %76 : vector<1x2x256xf32> to vector<2x256xf32>
    %cst_36 = arith.constant dense<0.000000e+00> : vector<2x8xf32>
    %78 = tpu.matmul %77, %6, %cst_36 {dimension_numbers = #tpu.dot_dimension_numbers<[1], [0], [0], [1], [0, 0, 1, 1], [], []>} : vector<2x256xf32>, vector<256x8xf32>, vector<2x8xf32> -> vector<2x8xf32>
    %c0_37 = arith.constant 0 : index
    %c0_38 = arith.constant 0 : index
    %c0_39 = arith.constant 0 : index
    %79 = vector.load %arg10[%c0_37, %c0_38, %c0_39] : memref<1x2x8xf32, #tpu.memory_space<vmem>>, vector<1x2x8xf32>
    %80 = vector.shape_cast %79 : vector<1x2x8xf32> to vector<2x8xf32>
    %81 = arith.subf %78, %80 : vector<2x8xf32>
    %82 = math.absf %81 : vector<2x8xf32>
    %83 = vector.broadcast %8 : vector<1x8xf32> to vector<2x8xf32>
    %84 = arith.mulf %82, %83 : vector<2x8xf32>
    %c3_i32 = arith.constant 3 : i32
    %85 = vector.broadcast %c3_i32 : i32 to vector<1x128xi32>
    %86 = arith.cmpi eq, %9, %85 : vector<1x128xi32>
    %87 = vector.shape_cast %84 : vector<2x8xf32> to vector<1x2x8xf32>
    %cst_40 = arith.constant dense<0.000000e+00> : vector<1xf32>
    %88 = vector.multi_reduction <add>, %87, %cst_40 [1, 2] : vector<1x2x8xf32> to vector<1xf32>
    %89 = vector.shape_cast %88 : vector<1xf32> to vector<1x1x1xf32>
    %90 = vector.extract %89[0, 0, 0] : f32 from vector<1x1x1xf32>
    %cst_41 = arith.constant 0.000000e+00 : f32
    %91 = vector.broadcast %90 : f32 to vector<1x128xf32>
    %92 = vector.broadcast %cst_41 : f32 to vector<1x128xf32>
    %93 = arith.select %86, %91, %92 : vector<1x128xi1>, vector<1x128xf32>
    %94 = arith.addf %75, %93 : vector<1x128xf32>
    %c0_42 = arith.constant 0 : index
    %c0_43 = arith.constant 0 : index
    %c0_44 = arith.constant 0 : index
    %95 = vector.load %arg11[%c0_42, %c0_43, %c0_44] : memref<1x1x128xf32, #tpu.memory_space<vmem>>, vector<1x1x128xf32>
    %96 = vector.shape_cast %95 : vector<1x1x128xf32> to vector<1x128xf32>
    %97 = vector.shape_cast %94 : vector<1x128xf32> to vector<1x1x128xf32>
    tpu.vector_store %arg11[%c0_42, %c0_43, %c0_44], %97 {strides = array<i32>} : memref<1x1x128xf32, #tpu.memory_space<vmem>>, vector<1x1x128xf32>,
    return
  }
  func.func @transform_0(%arg0: i32) -> (i32, i32, i32) {
    %c0_i32 = arith.constant 0 : i32
    %c0_i32_0 = arith.constant 0 : i32
    %c0_i32_1 = arith.constant 0 : i32
    return %arg0, %c0_i32, %c0_i32_0 : i32, i32, i32
  }
  func.func @transform_1(%arg0: i32) -> (i32, i32, i32) {
    %c0_i32 = arith.constant 0 : i32
    %c0_i32_0 = arith.constant 0 : i32
    %c0_i32_1 = arith.constant 0 : i32
    return %arg0, %c0_i32, %c0_i32_0 : i32, i32, i32
  }
  func.func @transform_2(%arg0: i32) -> (i32, i32, i32) {
    %c0_i32 = arith.constant 0 : i32
    %c0_i32_0 = arith.constant 0 : i32
    %c0_i32_1 = arith.constant 0 : i32
    return %arg0, %c0_i32, %c0_i32_0 : i32, i32, i32
  }
  func.func @transform_3(%arg0: i32) -> (i32, i32, i32) {
    %c0_i32 = arith.constant 0 : i32
    %c0_i32_0 = arith.constant 0 : i32
    %c0_i32_1 = arith.constant 0 : i32
    return %arg0, %c0_i32, %c0_i32_0 : i32, i32, i32
  }
  func.func @transform_4(%arg0: i32) -> (i32, i32, i32) {
    %c0_i32 = arith.constant 0 : i32
    %c0_i32_0 = arith.constant 0 : i32
    %c0_i32_1 = arith.constant 0 : i32
    return %arg0, %c0_i32, %c0_i32_0 : i32, i32, i32
  }
  func.func @transform_5(%arg0: i32) -> (i32, i32, i32) {
    %c0_i32 = arith.constant 0 : i32
    %c0_i32_0 = arith.constant 0 : i32
    %c0_i32_1 = arith.constant 0 : i32
    return %arg0, %c0_i32, %c0_i32_0 : i32, i32, i32
  }
  func.func @transform_6(%arg0: i32) -> (i32, i32, i32) {
    %c0_i32 = arith.constant 0 : i32
    %c0_i32_0 = arith.constant 0 : i32
    %c0_i32_1 = arith.constant 0 : i32
    return %arg0, %c0_i32, %c0_i32_0 : i32, i32, i32
  }
  func.func @transform_7(%arg0: i32) -> (i32, i32, i32) {
    %c0_i32 = arith.constant 0 : i32
    %c0_i32_0 = arith.constant 0 : i32
    %c0_i32_1 = arith.constant 0 : i32
    return %arg0, %c0_i32, %c0_i32_0 : i32, i32, i32
  }
  func.func @transform_8(%arg0: i32) -> (i32, i32, i32) {
    %c0_i32 = arith.constant 0 : i32
    %c0_i32_0 = arith.constant 0 : i32
    %c0_i32_1 = arith.constant 0 : i32
    return %arg0, %c0_i32, %c0_i32_0 : i32, i32, i32
  }
  func.func @transform_9(%arg0: i32) -> (i32, i32, i32) {
    %c0_i32 = arith.constant 0 : i32
    %c0_i32_0 = arith.constant 0 : i32
    %c0_i32_1 = arith.constant 0 : i32
    return %arg0, %c0_i32, %c0_i32_0 : i32, i32, i32
  }
  func.func @transform_10(%arg0: i32) -> (i32, i32, i32) {
    %c0_i32 = arith.constant 0 : i32
    %c0_i32_0 = arith.constant 0 : i32
    %c0_i32_1 = arith.constant 0 : i32
    return %arg0, %c0_i32, %c0_i32_0 : i32, i32, i32
  }
}

module attributes {stable_mosaic.version = 11 : i64} {
  func.func @_focal_kernel(%arg0: i32, %arg1: memref<8x512xf32, #tpu.memory_space<vmem>>, %arg2: memref<8x512xf32, #tpu.memory_space<vmem>>, %arg3: memref<1x1x128xf32, #tpu.memory_space<vmem>>) attributes {dimension_semantics = [#tpu.dimension_semantics<parallel>], iteration_bounds = array<i64: 1>, scalar_prefetch = 0 : i64, scratch_operands = 0 : i64, tpu.core_type = #tpu.core_type<tc>, window_params = [{transform_indices = @transform_0, window_bounds = array<i64: 8, 512>}, {transform_indices = @transform_1, window_bounds = array<i64: 8, 512>}, {transform_indices = @transform_2, window_bounds = array<i64: 1, 1, 128>}]} {
    %c0 = arith.constant 0 : index
    %c0_0 = arith.constant 0 : index
    %0 = vector.load %arg1[%c0, %c0_0] : memref<8x512xf32, #tpu.memory_space<vmem>>, vector<8x512xf32>
    %c0_1 = arith.constant 0 : index
    %c0_2 = arith.constant 0 : index
    %1 = vector.load %arg2[%c0_1, %c0_2] : memref<8x512xf32, #tpu.memory_space<vmem>>, vector<8x512xf32>
    %2 = arith.negf %0 : vector<8x512xf32>
    %3 = math.exp %2 : vector<8x512xf32>
    %cst = arith.constant 1.000000e+00 : f32
    %4 = vector.broadcast %cst : f32 to vector<8x512xf32>
    %5 = arith.addf %4, %3 : vector<8x512xf32>
    %6 = arith.divf %4, %5 : vector<8x512xf32>
    %cst_3 = arith.constant 9.99999974E-5 : f32
    %cst_4 = arith.constant 0.999899983 : f32
    %7 = vector.broadcast %cst_3 : f32 to vector<8x512xf32>
    %8 = arith.maximumf %7, %6 : vector<8x512xf32>
    %9 = vector.broadcast %cst_4 : f32 to vector<8x512xf32>
    %10 = arith.minimumf %9, %8 : vector<8x512xf32>
    %cst_5 = arith.constant 1.000000e+00 : f32
    %11 = vector.broadcast %cst_5 : f32 to vector<8x512xf32>
    %12 = arith.cmpf oeq, %1, %11 : vector<8x512xf32>
    %cst_6 = arith.constant 1.000000e+00 : f32
    %13 = vector.broadcast %cst_6 : f32 to vector<8x512xf32>
    %14 = arith.cmpf olt, %1, %13 : vector<8x512xf32>
    %15 = arith.extui %12 : vector<8x512xi1> to vector<8x512xi32>
    %16 = arith.sitofp %15 : vector<8x512xi32> to vector<8x512xf32>
    %17 = arith.extui %14 : vector<8x512xi1> to vector<8x512xi32>
    %18 = arith.sitofp %17 : vector<8x512xi32> to vector<8x512xf32>
    %cst_7 = arith.constant 1.000000e+00 : f32
    %19 = vector.broadcast %cst_7 : f32 to vector<8x512xf32>
    %20 = arith.subf %19, %10 : vector<8x512xf32>
    %21 = arith.select %12, %10, %20 : vector<8x512xi1>, vector<8x512xf32>
    %cst_8 = arith.constant 1.000000e+00 : f32
    %22 = vector.broadcast %cst_8 : f32 to vector<8x512xf32>
    %23 = arith.subf %22, %10 : vector<8x512xf32>
    %24 = arith.mulf %23, %23 : vector<8x512xf32>
    %25 = arith.mulf %10, %10 : vector<8x512xf32>
    %cst_9 = arith.constant 1.000000e+00 : f32
    %26 = vector.broadcast %cst_9 : f32 to vector<8x512xf32>
    %27 = arith.subf %26, %1 : vector<8x512xf32>
    %28 = arith.mulf %27, %27 : vector<8x512xf32>
    %29 = arith.mulf %28, %28 : vector<8x512xf32>
    %30 = arith.mulf %25, %29 : vector<8x512xf32>
    %31 = arith.mulf %30, %18 : vector<8x512xf32>
    %32 = arith.select %12, %24, %31 : vector<8x512xi1>, vector<8x512xf32>
    %33 = math.log %21 : vector<8x512xf32>
    %34 = arith.mulf %33, %32 : vector<8x512xf32>
    %35 = vector.shape_cast %34 : vector<8x512xf32> to vector<1x8x512xf32>
    %cst_10 = arith.constant dense<0.000000e+00> : vector<1xf32>
    %36 = vector.multi_reduction <add>, %35, %cst_10 [1, 2] : vector<1x8x512xf32> to vector<1xf32>
    %37 = vector.shape_cast %36 : vector<1xf32> to vector<1x1x1xf32>
    %38 = vector.extract %37[0, 0, 0] : f32 from vector<1x1x1xf32>
    %39 = arith.mulf %34, %16 : vector<8x512xf32>
    %40 = vector.shape_cast %39 : vector<8x512xf32> to vector<1x8x512xf32>
    %cst_11 = arith.constant dense<0.000000e+00> : vector<1xf32>
    %41 = vector.multi_reduction <add>, %40, %cst_11 [1, 2] : vector<1x8x512xf32> to vector<1xf32>
    %42 = vector.shape_cast %41 : vector<1xf32> to vector<1x1x1xf32>
    %43 = vector.extract %42[0, 0, 0] : f32 from vector<1x1x1xf32>
    %44 = vector.shape_cast %16 : vector<8x512xf32> to vector<1x8x512xf32>
    %cst_12 = arith.constant dense<0.000000e+00> : vector<1xf32>
    %45 = vector.multi_reduction <add>, %44, %cst_12 [1, 2] : vector<1x8x512xf32> to vector<1xf32>
    %46 = vector.shape_cast %45 : vector<1xf32> to vector<1x1x1xf32>
    %47 = vector.extract %46[0, 0, 0] : f32 from vector<1x1x1xf32>
    %48 = tpu.iota {dimensions = array<i32: 1>} : vector<1x128xi32>
    %c0_i32 = arith.constant 0 : i32
    %49 = vector.broadcast %c0_i32 : i32 to vector<1x128xi32>
    %50 = arith.cmpi eq, %48, %49 : vector<1x128xi32>
    %cst_13 = arith.constant 0.000000e+00 : f32
    %51 = vector.broadcast %38 : f32 to vector<1x128xf32>
    %52 = vector.broadcast %cst_13 : f32 to vector<1x128xf32>
    %53 = arith.select %50, %51, %52 : vector<1x128xi1>, vector<1x128xf32>
    %c1_i32 = arith.constant 1 : i32
    %54 = vector.broadcast %c1_i32 : i32 to vector<1x128xi32>
    %55 = arith.cmpi eq, %48, %54 : vector<1x128xi32>
    %cst_14 = arith.constant 0.000000e+00 : f32
    %56 = vector.broadcast %43 : f32 to vector<1x128xf32>
    %57 = vector.broadcast %cst_14 : f32 to vector<1x128xf32>
    %58 = arith.select %55, %56, %57 : vector<1x128xi1>, vector<1x128xf32>
    %59 = arith.addf %53, %58 : vector<1x128xf32>
    %c2_i32 = arith.constant 2 : i32
    %60 = vector.broadcast %c2_i32 : i32 to vector<1x128xi32>
    %61 = arith.cmpi eq, %48, %60 : vector<1x128xi32>
    %cst_15 = arith.constant 0.000000e+00 : f32
    %62 = vector.broadcast %47 : f32 to vector<1x128xf32>
    %63 = vector.broadcast %cst_15 : f32 to vector<1x128xf32>
    %64 = arith.select %61, %62, %63 : vector<1x128xi1>, vector<1x128xf32>
    %65 = arith.addf %59, %64 : vector<1x128xf32>
    %c0_16 = arith.constant 0 : index
    %c0_17 = arith.constant 0 : index
    %c0_18 = arith.constant 0 : index
    %66 = vector.load %arg3[%c0_16, %c0_17, %c0_18] : memref<1x1x128xf32, #tpu.memory_space<vmem>>, vector<1x1x128xf32>
    %67 = vector.shape_cast %66 : vector<1x1x128xf32> to vector<1x128xf32>
    %68 = vector.shape_cast %65 : vector<1x128xf32> to vector<1x1x128xf32>
    tpu.vector_store %arg3[%c0_16, %c0_17, %c0_18], %68 {strides = array<i32>} : memref<1x1x128xf32, #tpu.memory_space<vmem>>, vector<1x1x128xf32>,
    return
  }
  func.func @transform_0(%arg0: i32) -> (i32, i32) {
    %c0_i32 = arith.constant 0 : i32
    %c0_i32_0 = arith.constant 0 : i32
    return %arg0, %c0_i32 : i32, i32
  }
  func.func @transform_1(%arg0: i32) -> (i32, i32) {
    %c0_i32 = arith.constant 0 : i32
    %c0_i32_0 = arith.constant 0 : i32
    return %arg0, %c0_i32 : i32, i32
  }
  func.func @transform_2(%arg0: i32) -> (i32, i32, i32) {
    %c0_i32 = arith.constant 0 : i32
    %c0_i32_0 = arith.constant 0 : i32
    %c0_i32_1 = arith.constant 0 : i32
    return %arg0, %c0_i32, %c0_i32_0 : i32, i32, i32
  }
}

module attributes {stable_mosaic.version = 11 : i64} {
  func.func @_l1_sum_kernel(%arg0: i32, %arg1: memref<8x512xf32, #tpu.memory_space<vmem>>, %arg2: memref<8x512xf32, #tpu.memory_space<vmem>>, %arg3: memref<1x1x128xf32, #tpu.memory_space<vmem>>) attributes {dimension_semantics = [#tpu.dimension_semantics<parallel>], iteration_bounds = array<i64: 1>, scalar_prefetch = 0 : i64, scratch_operands = 0 : i64, tpu.core_type = #tpu.core_type<tc>, window_params = [{transform_indices = @transform_0, window_bounds = array<i64: 8, 512>}, {transform_indices = @transform_1, window_bounds = array<i64: 8, 512>}, {transform_indices = @transform_2, window_bounds = array<i64: 1, 1, 128>}]} {
    %c0 = arith.constant 0 : index
    %c0_0 = arith.constant 0 : index
    %0 = vector.load %arg1[%c0, %c0_0] : memref<8x512xf32, #tpu.memory_space<vmem>>, vector<8x512xf32>
    %c0_1 = arith.constant 0 : index
    %c0_2 = arith.constant 0 : index
    %1 = vector.load %arg2[%c0_1, %c0_2] : memref<8x512xf32, #tpu.memory_space<vmem>>, vector<8x512xf32>
    %2 = arith.subf %0, %1 : vector<8x512xf32>
    %3 = math.absf %2 : vector<8x512xf32>
    %4 = vector.shape_cast %3 : vector<8x512xf32> to vector<1x8x512xf32>
    %cst = arith.constant dense<0.000000e+00> : vector<1xf32>
    %5 = vector.multi_reduction <add>, %4, %cst [1, 2] : vector<1x8x512xf32> to vector<1xf32>
    %6 = vector.shape_cast %5 : vector<1xf32> to vector<1x1x1xf32>
    %7 = vector.extract %6[0, 0, 0] : f32 from vector<1x1x1xf32>
    %8 = tpu.iota {dimensions = array<i32: 1>} : vector<1x128xi32>
    %c0_i32 = arith.constant 0 : i32
    %9 = vector.broadcast %c0_i32 : i32 to vector<1x128xi32>
    %10 = arith.cmpi eq, %8, %9 : vector<1x128xi32>
    %cst_3 = arith.constant 0.000000e+00 : f32
    %11 = vector.broadcast %7 : f32 to vector<1x128xf32>
    %12 = vector.broadcast %cst_3 : f32 to vector<1x128xf32>
    %13 = arith.select %10, %11, %12 : vector<1x128xi1>, vector<1x128xf32>
    %c0_4 = arith.constant 0 : index
    %c0_5 = arith.constant 0 : index
    %c0_6 = arith.constant 0 : index
    %14 = vector.load %arg3[%c0_4, %c0_5, %c0_6] : memref<1x1x128xf32, #tpu.memory_space<vmem>>, vector<1x1x128xf32>
    %15 = vector.shape_cast %14 : vector<1x1x128xf32> to vector<1x128xf32>
    %16 = vector.shape_cast %13 : vector<1x128xf32> to vector<1x1x128xf32>
    tpu.vector_store %arg3[%c0_4, %c0_5, %c0_6], %16 {strides = array<i32>} : memref<1x1x128xf32, #tpu.memory_space<vmem>>, vector<1x1x128xf32>,
    return
  }
  func.func @transform_0(%arg0: i32) -> (i32, i32) {
    %c0_i32 = arith.constant 0 : i32
    %c0_i32_0 = arith.constant 0 : i32
    return %arg0, %c0_i32 : i32, i32
  }
  func.func @transform_1(%arg0: i32) -> (i32, i32) {
    %c0_i32 = arith.constant 0 : i32
    %c0_i32_0 = arith.constant 0 : i32
    return %arg0, %c0_i32 : i32, i32
  }
  func.func @transform_2(%arg0: i32) -> (i32, i32, i32) {
    %c0_i32 = arith.constant 0 : i32
    %c0_i32_0 = arith.constant 0 : i32
    %c0_i32_1 = arith.constant 0 : i32
    return %arg0, %c0_i32, %c0_i32_0 : i32, i32, i32
  }
}

</mosaic_0001>

<bundles_post_ra>
// kernel: _lambda_.7
= control target key start
LH: loop header
LB: loop body
LE: loop exit
PB: predicated region body
PF: predicated region fallthrough
CT: control target
= control target key end

     0   :  { %s974_s15 = smov 0   ;;  %s1226_s0 = inlined_call_operand.vmem [shape: s32[2,1,8], index: 0, kind: input, shape index: {}]   ;;  %s1227_s1 = inlined_call_operand.vmem [shape: f32[2,1,8], index: 1, kind: input, shape index: {}]   ;;  %s1228_s2 = inlined_call_operand.vmem [shape: f32[2,48,256], index: 2, kind: input, shape index: {}]   ;;  %s1229_s3 = inlined_call_operand.vmem [shape: f32[2,48,8], index: 3, kind: input, shape index: {}]   ;;  %s1230_s4 = inlined_call_operand.vmem [shape: f32[2,1,128], index: 4, kind: output, shape index: {}]  }
   0x1 LB: > { %s747_s16 = sadd.s32 4294967295, %s946_s15   ;;  %p751_p0 = scmp.ge.s32.totalorder %s946_s15, 1  ;;  %s946_s15 = sphi %s974_s15, %s14_s15  }
   0x2   : > { %p188_p1 = scmp.lt.s32.totalorder %s946_s15, 3 }
   0x4   : > { %p189_p2 = pnand %p751_p0, %p188_p1 }
   0x5   : > { %p223_p3 = scmp.lt.s32.totalorder (!%p189_p2), %s747_s16, 1 }
   0x6   : > { %192 = sbr.rel (%p189_p2) target bundleno = 542 (0x21e), region = 36 }
   0xb   : > { %v242_v0 = vlaneseq  ;;  %s1232_s16 = smov (!%p223_p3, %s747_s16), 1  ;;  %v948_v10 = vmov 1.0  }
   0xc   : > { %s225_s19 = scalar_lea.vmem %s1226_s0, %s1232_s16  ;;  %s903_s20 = smul.u32 96, %s1232_s16 }
   0xd   : > { %v985_v1 = vshrl.u32 %v242_v0, 7  ;;  %v995_v6 = vld [vmem:[%s225_s19] ss:$0 sm:$0xff]  ;;  %s228_s26 = scalar_lea.vmem %s1227_s1, %s1232_s16  ;;  %s904_s27 = smul.u32 48, %s1232_s16 }
   0xe   : > { %s1112_s23 = scalar_lea.vmem %s1228_s2, %s903_s20  ;;  %v1143_v47 = vld [vmem:[%s228_s26] sm:$0x1]  ;;  %s241_s11 = scalar_lea.vmem %s1230_s4, %s1232_s16 }
   0xf   : > { %v274_v2 = vadd.s32 248, %v985_v1  ;;  %v258_v3 = vadd.s32 120, %v985_v1  ;;  %v273_v4 = vadd.s32 240, %v985_v1  ;;  %v257_v5 = vadd.s32 112, %v985_v1  ;;  %v377_v35 = vld [vmem:[%s1112_s23 + $0x8] sm:$0xff]  ;;  %v383_v36 = vld [vmem:[%s1112_s23 + $0x38] sm:$0xff]  ;;  %s1185_s30 = scalar_lea.vmem %s1229_s3, %s904_s27 }
  0x10   : > { %v272_v7 = vadd.s32 232, %v985_v1  ;;  %v256_v8 = vadd.s32 104, %v985_v1  ;;  %v271_v9 = vadd.s32 224, %v985_v1  ;;  %v255_v11 = vadd.s32 96, %v985_v1  ;;  %v376_v37 = vld [vmem:[%s1112_s23] sm:$0xff]  ;;  %v382_v38 = vld [vmem:[%s1112_s23 + $0x30] sm:$0xff]  ;;  %452 = vmatprep.mubr.f32.mxu0 %v377_v35  ;;  %467 = vmatprep.mubr.f32.mxu1 %v383_v36 }
  0x11   : > { %vm311_vm0 = vcmp.eq.s32.totalorder %v274_v2, %v995_v6  ;;  %vm295_vm1 = vcmp.eq.s32.totalorder %v258_v3, %v995_v6  ;;  %vm310_vm2 = vcmp.eq.s32.totalorder %v273_v4, %v995_v6  ;;  %vm294_vm3 = vcmp.eq.s32.totalorder %v257_v5, %v995_v6  ;;  %v379_v39 = vld [vmem:[%s1112_s23 + $0x18] sm:$0xff]  ;;  %v385_v40 = vld [vmem:[%s1112_s23 + $0x48] sm:$0xff]  ;;  %v378_v41 = vld [vmem:[%s1112_s23 + $0x10] sm:$0xff] }
  0x12   : > { %821 = vmatprep.subr.msk.mxu0 %vm311_vm0, %v948_v10  ;;  %871 = vmatprep.subr.msk.mxu1 %vm311_vm0, %v948_v10  ;;  %vm309_vm4 = vcmp.eq.s32.totalorder %v272_v7, %v995_v6  ;;  %v270_v12 = vadd.s32 216, %v985_v1  ;;  %vm293_vm5 = vcmp.eq.s32.totalorder %v256_v8, %v995_v6  ;;  %v254_v13 = vadd.s32 88, %v985_v1  ;;  %v384_v42 = vld [vmem:[%s1112_s23 + $0x40] sm:$0xff]  ;;  %v381_v43 = vld [vmem:[%s1112_s23 + $0x28] sm:$0xff]  ;;  %v387_v44 = vld [vmem:[%s1112_s23 + $0x58] sm:$0xff] }
  0x13   : > { %822 = vmatpush3.msk.msra.mxu0 %vm295_vm1, %v948_v10  ;;  %887 = vmatpush3.msk.msra.mxu1 %vm295_vm1, %v948_v10  ;;  %vm308_vm6 = vcmp.eq.s32.totalorder %v271_v9, %v995_v6  ;;  %v269_v14 = vadd.s32 208, %v985_v1  ;;  %vm292_vm7 = vcmp.eq.s32.totalorder %v255_v11, %v995_v6  ;;  %v253_v15 = vadd.s32 80, %v985_v1  ;;  %v380_v45 = vld [vmem:[%s1112_s23 + $0x20] sm:$0xff]  ;;  %v386_v46 = vld [vmem:[%s1112_s23 + $0x50] sm:$0xff] }
  0x14   : > { %823 = vmatprep.subr.msk.mxu0 %vm310_vm2, %v948_v10  ;;  %872 = vmatprep.subr.msk.mxu1 %vm310_vm2, %v948_v10  ;;  %vm307_vm8 = vcmp.eq.s32.totalorder %v270_v12, %v995_v6  ;;  %v268_v16 = vadd.s32 200, %v985_v1  ;;  %vm291_vm9 = vcmp.eq.s32.totalorder %v254_v13, %v995_v6  ;;  %v252_v17 = vadd.s32 72, %v985_v1 }
  0x15   : > { %824 = vmatpush3.msk.msra.mxu0 %vm294_vm3, %v948_v10  ;;  %888 = vmatpush3.msk.msra.mxu1 %vm294_vm3, %v948_v10  ;;  %vm306_vm10 = vcmp.eq.s32.totalorder %v269_v14, %v995_v6  ;;  %v267_v18 = vadd.s32 192, %v985_v1  ;;  %vm290_vm11 = vcmp.eq.s32.totalorder %v253_v15, %v995_v6  ;;  %v251_v19 = vadd.s32 64, %v985_v1 }
  0x16   : > { %825 = vmatprep.subr.msk.mxu0 %vm309_vm4, %v948_v10  ;;  %873 = vmatprep.subr.msk.mxu1 %vm309_vm4, %v948_v10  ;;  %vm305_vm12 = vcmp.eq.s32.totalorder %v268_v16, %v995_v6  ;;  %v266_v20 = vadd.s32 184, %v985_v1  ;;  %vm289_vm13 = vcmp.eq.s32.totalorder %v252_v17, %v995_v6  ;;  %v250_v21 = vadd.s32 56, %v985_v1 }
  0x17   : > { %826 = vmatpush3.msk.msra.mxu0 %vm293_vm5, %v948_v10  ;;  %889 = vmatpush3.msk.msra.mxu1 %vm293_vm5, %v948_v10  ;;  %vm304_vm14 = vcmp.eq.s32.totalorder %v267_v18, %v995_v6  ;;  %v265_v22 = vadd.s32 176, %v985_v1  ;;  %vm288_vm15 = vcmp.eq.s32.totalorder %v251_v19, %v995_v6  ;;  %v249_v23 = vadd.s32 48, %v985_v1 }
  0x18   : > { %827 = vmatprep.subr.msk.mxu0 %vm308_vm6, %v948_v10  ;;  %874 = vmatprep.subr.msk.mxu1 %vm308_vm6, %v948_v10  ;;  %vm303_vm0 = vcmp.eq.s32.totalorder %v266_v20, %v995_v6  ;;  %v264_v24 = vadd.s32 168, %v985_v1  ;;  %vm287_vm1 = vcmp.eq.s32.totalorder %v250_v21, %v995_v6  ;;  %v248_v25 = vadd.s32 40, %v985_v1 }
  0x19   : > { %828 = vmatpush3.msk.msra.mxu0 %vm292_vm7, %v948_v10  ;;  %890 = vmatpush3.msk.msra.mxu1 %vm292_vm7, %v948_v10  ;;  %vm302_vm2 = vcmp.eq.s32.totalorder %v265_v22, %v995_v6  ;;  %v263_v26 = vadd.s32 160, %v985_v1  ;;  %vm286_vm3 = vcmp.eq.s32.totalorder %v249_v23, %v995_v6  ;;  %v247_v27 = vadd.s32 32, %v985_v1 }
  0x1a   : > { %829 = vmatprep.subr.msk.mxu0 %vm307_vm8, %v948_v10  ;;  %875 = vmatprep.subr.msk.mxu1 %vm307_vm8, %v948_v10  ;;  %vm301_vm4 = vcmp.eq.s32.totalorder %v264_v24, %v995_v6  ;;  %v262_v28 = vadd.s32 152, %v985_v1  ;;  %vm285_vm5 = vcmp.eq.s32.totalorder %v248_v25, %v995_v6  ;;  %v246_v29 = vadd.s32 24, %v985_v1 }
  0x1b   : > { %830 = vmatpush3.msk.msra.mxu0 %vm291_vm9, %v948_v10  ;;  %891 = vmatpush3.msk.msra.mxu1 %vm291_vm9, %v948_v10  ;;  %vm300_vm6 = vcmp.eq.s32.totalorder %v263_v26, %v995_v6  ;;  %v261_v30 = vadd.s32 144, %v985_v1  ;;  %vm284_vm7 = vcmp.eq.s32.totalorder %v247_v27, %v995_v6  ;;  %v245_v31 = vadd.s32 16, %v985_v1 }
  0x1c   : > { %831 = vmatprep.subr.msk.mxu0 %vm306_vm10, %v948_v10  ;;  %876 = vmatprep.subr.msk.mxu1 %vm306_vm10, %v948_v10  ;;  %vm299_vm8 = vcmp.eq.s32.totalorder %v262_v28, %v995_v6  ;;  %v260_v32 = vadd.s32 136, %v985_v1  ;;  %vm283_vm9 = vcmp.eq.s32.totalorder %v246_v29, %v995_v6  ;;  %v244_v33 = vadd.s32 8, %v985_v1 }
  0x1d   : > { %832 = vmatpush3.msk.msra.mxu0 %vm290_vm11, %v948_v10  ;;  %892 = vmatpush3.msk.msra.mxu1 %vm290_vm11, %v948_v10  ;;  %vm298_vm10 = vcmp.eq.s32.totalorder %v261_v30, %v995_v6  ;;  %v259_v34 = vadd.s32 128, %v985_v1  ;;  %vm282_vm11 = vcmp.eq.s32.totalorder %v245_v31, %v995_v6 }
  0x1e   : > { %833 = vmatprep.subr.msk.mxu0 %vm305_vm12, %v948_v10  ;;  %877 = vmatprep.subr.msk.mxu1 %vm305_vm12, %v948_v10  ;;  %vm297_vm12 = vcmp.eq.s32.totalorder %v260_v32, %v995_v6 }
  0x1f   : > { %834 = vmatpush3.msk.msra.mxu0 %vm289_vm13, %v948_v10  ;;  %893 = vmatpush3.msk.msra.mxu1 %vm289_vm13, %v948_v10  ;;  %vm281_vm13 = vcmp.eq.s32.totalorder %v244_v33, %v995_v6 }
  0x20   : > { %835 = vmatprep.subr.msk.mxu0 %vm304_vm14, %v948_v10  ;;  %878 = vmatprep.subr.msk.mxu1 %vm304_vm14, %v948_v10  ;;  %vm296_vm14 = vcmp.eq.s32.totalorder %v259_v34, %v995_v6 }
  0x21   : > { %836 = vmatpush3.msk.msra.mxu0 %vm288_vm15, %v948_v10  ;;  %894 = vmatpush3.msk.msra.mxu1 %vm288_vm15, %v948_v10  ;;  %vm280_vm15 = vcmp.eq.s32.totalorder %v985_v1, %v995_v6 }
  0x22   : > { %837 = vmatprep.subr.msk.mxu0 %vm303_vm0, %v948_v10  ;;  %879 = vmatprep.subr.msk.mxu1 %vm303_vm0, %v948_v10  ;;  %vm493_vm0 = vcmask 57344  }
  0x23   : > { %838 = vmatpush3.msk.msra.mxu0 %vm287_vm1, %v948_v10  ;;  %895 = vmatpush3.msk.msra.mxu1 %vm287_vm1, %v948_v10  ;;  %v494_v48 = vsel %vm493_vm0, %v1143_v47, 0.0  ;;  %vm506_vm1 = vcmask 64512  }
  0x24   : > { %839 = vmatprep.subr.msk.mxu0 %vm302_vm2, %v948_v10  ;;  %880 = vmatprep.subr.msk.mxu1 %vm302_vm2, %v948_v10 }
  0x25   : > { %840 = vmatpush3.msk.msra.mxu0 %vm286_vm3, %v948_v10  ;;  %896 = vmatpush3.msk.msra.mxu1 %vm286_vm3, %v948_v10 }
  0x26   : > { %841 = vmatprep.subr.msk.mxu0 %vm301_vm4, %v948_v10  ;;  %881 = vmatprep.subr.msk.mxu1 %vm301_vm4, %v948_v10 }
  0x27   : > { %842 = vmatpush3.msk.msra.mxu0 %vm285_vm5, %v948_v10  ;;  %897 = vmatpush3.msk.msra.mxu1 %vm285_vm5, %v948_v10 }
  0x28   : > { %843 = vmatprep.subr.msk.mxu0 %vm300_vm6, %v948_v10  ;;  %882 = vmatprep.subr.msk.mxu1 %vm300_vm6, %v948_v10 }
  0x29   : > { %844 = vmatpush3.msk.msra.mxu0 %vm284_vm7, %v948_v10  ;;  %898 = vmatpush3.msk.msra.mxu1 %vm284_vm7, %v948_v10 }
  0x2a   : > { %845 = vmatprep.subr.msk.mxu0 %vm299_vm8, %v948_v10  ;;  %883 = vmatprep.subr.msk.mxu1 %vm299_vm8, %v948_v10 }
  0x2b   : > { %846 = vmatpush3.msk.msra.mxu0 %vm283_vm9, %v948_v10  ;;  %899 = vmatpush3.msk.msra.mxu1 %vm283_vm9, %v948_v10 }
  0x2c   : > { %847 = vmatprep.subr.msk.mxu0 %vm298_vm10, %v948_v10  ;;  %884 = vmatprep.subr.msk.mxu1 %vm298_vm10, %v948_v10 }
  0x2d   : > { %848 = vmatpush3.msk.msra.mxu0 %vm282_vm11, %v948_v10  ;;  %900 = vmatpush3.msk.msra.mxu1 %vm282_vm11, %v948_v10 }
  0x2e   : > { %849 = vmatprep.subr.msk.mxu0 %vm297_vm12, %v948_v10  ;;  %885 = vmatprep.subr.msk.mxu1 %vm297_vm12, %v948_v10 }
  0x2f   : > { %850 = vmatpush3.msk.msra.mxu0 %vm281_vm13, %v948_v10  ;;  %901 = vmatpush3.msk.msra.mxu1 %vm281_vm13, %v948_v10 }
  0x30   : > { %851 = vmatprep.subr.msk.mxu0 %vm296_vm14, %v948_v10  ;;  %886 = vmatprep.subr.msk.mxu1 %vm296_vm14, %v948_v10 }
  0x31   : > { %852 = vmatpush3.msk.msra.mxu0 %vm280_vm15, %v948_v10  ;;  %902 = vmatpush3.msk.msra.mxu1 %vm280_vm15, %v948_v10 }
  0x32   : > { %453 = vmatmul.mubr.f32.vlgmr.msra.gmra.mxu0 %v376_v37  ;;  %468 = vmatmul.mubr.f32.vlgmr.msra.gmra.mxu1 %v382_v38 }
  0x33   : > { %457 = vmatprep.mubr.f32.mxu0 %v379_v39  ;;  %472 = vmatprep.mubr.f32.mxu1 %v385_v40 }
  0x34   : > { %495 = vadd.xlane.f32.xlu0 %v494_v48 }
  0x36   : > { %458 = vmatmul.mubr.f32.gmra.mxu0 %v378_v41  ;;  %473 = vmatmul.mubr.f32.gmra.mxu1 %v384_v42 }
  0x37   : > { %462 = vmatprep.mubr.f32.mxu0 %v381_v43  ;;  %477 = vmatprep.mubr.f32.mxu1 %v387_v44  ;;  %v487_v44 = vld [vmem:[%s1185_s30 + $0x20] sm:$0xff] }
  0x3a   : > { %463 = vmatmul.mubr.f32.gmra.mxu0 %v380_v45  ;;  %478 = vmatmul.mubr.f32.gmra.mxu1 %v386_v46 }
  0xf2   : > { %v853_v49 = vpop.f32.mrf.mxu0  ;;  %v862_v50 = vpop.f32.mrf.mxu1 }
  0xf4   : > { %v854_v51 = vpop.f32.mrf.mxu0  ;;  %v863_v52 = vpop.f32.mrf.mxu1 }
  0xf5   : > { %v1149_v61 = vadd.f32 %v854_v51, %v853_v49  ;;  %v1151_v62 = vadd.f32 %v863_v52, %v862_v50  ;;  %v484_v51 = vld [vmem:[%s1185_s30 + $0x8] sm:$0xff] }
  0xf6   : > { %v856_v53 = vpop.f32.mrf.mxu0  ;;  %v865_v54 = vpop.f32.mrf.mxu1  ;;  %v488_v52 = vld [vmem:[%s1185_s30 + $0x28] sm:$0xff] }
  0xf7   : > { %v507_v8 = vsel %vm506_vm1, %v1149_v61, -inf  ;;  %v510_v9 = vsel %vm506_vm1, %v1151_v62, -inf }
  0xf8   : > { %v857_v55 = vpop.f32.mrf.mxu0  ;;  %v866_v56 = vpop.f32.mrf.mxu1 }
  0xf9   : > { %v1147_v57 = vadd.f32 %v857_v55, %v856_v53  ;;  %v867_v58 = vadd.f32 %v866_v56, %v865_v54  ;;  %v483_v53 = vld [vmem:[%s1185_s30] sm:$0xff] }
  0xfa   : > { %v859_v59 = vpop.f32.mrf.mxu0  ;;  %v868_v60 = vpop.f32.mrf.mxu1 }
  0xfb   : > { %v581_v63 = vsel %vm506_vm1, %v867_v58, -inf  ;;  %v508_v4 = vsel %vm506_vm1, %v1147_v57, -inf  ;;  %v601_v48 = vmul.f32 %v867_v58, %v487_v44 }
  0xfc   : > { %v582_v1 = vrot.slane %v581_v63, 4  ;;  %v860_v2 = vpop.f32.mrf.mxu0  ;;  %v869_v3 = vpop.f32.mrf.mxu1  ;;  %v511_v12 = vmax.f32 %v507_v8, %v508_v4 }
  0xfd   : > { %v1156_v5 = vadd.f32 %v860_v2, %v859_v59  ;;  %v870_v6 = vadd.f32 %v869_v3, %v868_v60  ;;  %v602_v56 = vsel %vm506_vm1, %v601_v48, 0.0  ;;  %v485_v59 = vld [vmem:[%s1185_s30 + $0x10] sm:$0xff] }
  0xfe   : > { %v583_v7 = vmax.f32 %v581_v63, %v582_v1  ;;  %v549_v1 = vmul.f32 %v1147_v57, %v484_v51 }
  0xff   : > { %v509_v10 = vsel %vm506_vm1, %v1156_v5, -inf  ;;  %v625_v11 = vsel %vm506_vm1, %v870_v6, -inf  ;;  %v645_v2 = vmul.f32 %v870_v6, %v488_v52 }
 0x100   : > { %v584_v13 = vrot.slane %v583_v7, 2  ;;  %v512_v14 = vmax.f32 %v509_v10, %v510_v9  ;;  %v626_v15 = vrot.slane %v625_v11, 4  ;;  %v603_v10 = vrot.slane %v602_v56, 4 }
 0x102   : > { %v585_v16 = vmax.f32 %v583_v7, %v584_v13  ;;  %v513_v17 = vmax.f32 %v511_v12, %v512_v14  ;;  %v627_v18 = vmax.f32 %v625_v11, %v626_v15  ;;  %v550_v11 = vmul.f32 %v1156_v5, %v485_v59 }
 0x104   : > { %v586_v19 = vrot.slane %v585_v16, 1  ;;  %v514_v20 = vrot.slane %v513_v17, 4  ;;  %v628_v21 = vrot.slane %v627_v18, 2 }
 0x106   : > { %v1165_v22 = vmax.f32 %v585_v16, %v586_v19  ;;  %v515_v23 = vmax.f32 %v513_v17, %v514_v20  ;;  %v629_v24 = vmax.f32 %v627_v18, %v628_v21  ;;  %v486_v19 = vld [vmem:[%s1185_s30 + $0x18] sm:$0xff] }
 0x108   : > { %v588_v25 = vsub.f32 %v867_v58, %v1165_v22  ;;  %v516_v26 = vrot.slane %v515_v23, 2  ;;  %v630_v27 = vrot.slane %v629_v24, 1  ;;  %v548_v58 = vmul.f32 %v1149_v61, %v483_v53 }
 0x10a   : > { %v589_v28 = vmul.f32 1.442695, %v588_v25  ;;  %v517_v29 = vmax.f32 %v515_v23, %v516_v26  ;;  %v1168_v30 = vmax.f32 %v629_v24, %v630_v27  ;;  %v552_v18 = vsel %vm506_vm1, %v548_v58, 0.0 }
 0x10b   : > { %v604_v23 = vadd.f32 %v603_v10, %v602_v56 }
 0x10c   : > { %922 = vpow2.f32 %v589_v28  ;;  %v518_v31 = vrot.slane %v517_v29, 1  ;;  %v632_v32 = vsub.f32 %v870_v6, %v1168_v30 }
 0x10e   : > { %v1171_v33 = vmax.f32 %v517_v29, %v518_v31  ;;  %v633_v34 = vmul.f32 1.442695, %v632_v32  ;;  %v551_v29 = vmul.f32 %v1151_v62, %v486_v19 }
 0x110   : > { %v520_v35 = vsub.f32 %v1149_v61, %v1171_v33  ;;  %v521_v36 = vsub.f32 %v1147_v57, %v1171_v33  ;;  %v522_v37 = vsub.f32 %v1156_v5, %v1171_v33  ;;  %v523_v38 = vsub.f32 %v1151_v62, %v1171_v33 }
 0x111   : > { %924 = vpow2.f32 %v633_v34  ;;  %v553_v57 = vsel %vm506_vm1, %v549_v1, 0.0  ;;  %v646_v61 = vsel %vm506_vm1, %v645_v2, 0.0  ;;  %v555_v5 = vsel %vm506_vm1, %v550_v11, 0.0 }
 0x112   : > { %v524_v39 = vmul.f32 1.442695, %v520_v35  ;;  %v526_v40 = vmul.f32 1.442695, %v521_v36  ;;  %v528_v41 = vmul.f32 1.442695, %v522_v37  ;;  %v554_v25 = vadd.f32 %v553_v57, %v552_v18 }
 0x113   : > { %v530_v42 = vmul.f32 1.442695, %v523_v38  ;;  %v647_v26 = vrot.slane %v646_v61, 4  ;;  %v605_v35 = vrot.slane %v604_v23, 2  ;;  %v557_v38 = vsel %vm506_vm1, %v551_v29, 0.0 }
 0x114   : > { %926 = vpow2.f32 %v524_v39  ;;  %v556_v31 = vadd.f32 %v555_v5, %v554_v25 }
 0x115   : > { %928 = vpow2.f32 %v526_v40  ;;  %v648_v36 = vadd.f32 %v647_v26, %v646_v61 }
 0x116   : > { %930 = vpow2.f32 %v528_v41  ;;  %v558_v39 = vadd.f32 %v557_v38, %v556_v31  ;;  %v606_v41 = vadd.f32 %v605_v35, %v604_v23 }
 0x117   : > { %932 = vpow2.f32 %v530_v42  ;;  %v649_v42 = vrot.slane %v648_v36, 2 }
 0x118   : > { %v559_v44 = vrot.slane %v558_v39, 4 }
 0x119   : > { %v923_v43 = vpop.eup %922 }
 0x11a   : > { %v591_v45 = vsel %vm506_vm1, %v923_v43, 0.0  ;;  %v560_v51 = vadd.f32 %v559_v44, %v558_v39 }
 0x11b   : > { %v592_v46 = vrot.slane %v591_v45, 4 }
 0x11d   : > { %v593_v49 = vadd.f32 %v592_v46, %v591_v45  ;;  %v607_v46 = vrot.slane %v606_v41, 1 }
 0x11e   : > { %v925_v50 = vpop.eup %924 }
 0x11f   : > { %v594_v54 = vrot.slane %v593_v49, 2  ;;  %v635_v55 = vsel %vm506_vm1, %v925_v50, 0.0  ;;  %v608_v53 = vadd.f32 %v607_v46, %v606_v41 }
 0x120   : > { %v636_v60 = vrot.slane %v635_v55, 4 }
 0x121   : > { %v927_v63 = vpop.eup %926  ;;  %v595_v3 = vadd.f32 %v594_v54, %v593_v49  ;;  %v650_v49 = vadd.f32 %v649_v42, %v648_v36 }
 0x122   : > { %v929_v4 = vpop.eup %928  ;;  %v637_v7 = vadd.f32 %v636_v60, %v635_v55  ;;  %v532_v8 = vsel %vm506_vm1, %v927_v63, 0.0  ;;  %v561_v60 = vrot.slane %v560_v51, 2 }
 0x123   : > { %v931_v9 = vpop.eup %930  ;;  %v596_v12 = vrot.slane %v595_v3, 1  ;;  %v533_v13 = vsel %vm506_vm1, %v929_v4, 0.0  ;;  %v651_v54 = vrot.slane %v650_v49, 1 }
 0x124   : > { %v933_v14 = vpop.eup %932  ;;  %v638_v15 = vrot.slane %v637_v7, 2  ;;  %v534_v16 = vadd.f32 %v533_v13, %v532_v8  ;;  %v535_v6 = vsel %vm506_vm1, %v931_v9, 0.0  ;;  %v562_v58 = vadd.f32 %v561_v60, %v560_v51 }
 0x125   : > { %v597_v17 = vadd.f32 %v596_v12, %v595_v3  ;;  %v537_v24 = vsel %vm506_vm1, %v933_v14, 0.0  ;;  %v652_v2 = vadd.f32 %v651_v54, %v650_v49 }
 0x126   : > { %v639_v20 = vadd.f32 %v638_v15, %v637_v7  ;;  %v536_v21 = vadd.f32 %v535_v6, %v534_v16  ;;  %v563_v8 = vrot.slane %v562_v58, 1  ;;  %v496_v15 = vpop.xlane.xlu0 %495 }
 0x127   : > { %934 = vlog2.f32 %v597_v17  ;;  %v497_v16 = vrot.slane %v496_v15, 4 }
 0x128   : > { %v640_v27 = vrot.slane %v639_v20, 1  ;;  %v538_v28 = vadd.f32 %v537_v24, %v536_v21  ;;  %v564_v12 = vadd.f32 %v563_v8, %v562_v58 }
 0x129   : > { %v498_v57 = vadd.f32 %v497_v16, %v496_v15 }
 0x12a   : > { %v641_v32 = vadd.f32 %v640_v27, %v639_v20  ;;  %v539_v34 = vrot.slane %v538_v28, 4 }
 0x12b   : > { %v499_v6 = vrot.slane %v498_v57, 2 }
 0x12c   : > { %936 = vlog2.f32 %v641_v32  ;;  %v540_v37 = vadd.f32 %v539_v34, %v538_v28 }
 0x12d   : > { %v500_v61 = vadd.f32 %v499_v6, %v498_v57 }
 0x12e   : > { %v541_v40 = vrot.slane %v540_v37, 2 }
 0x12f   : > { %v501_v17 = vrot.slane %v500_v61, 1 }
 0x130   : > { %v542_v43 = vadd.f32 %v541_v40, %v540_v37  ;;  %v491_v40 = vand.u32 127, %v242_v0 }
 0x131   : > { %v502_v18 = vadd.f32 %v501_v17, %v500_v61 }
 0x132   : > { %v543_v45 = vrot.slane %v542_v43, 1  ;;  %vm492_vm2 = vcmp.eq.s32.totalorder %v491_v40, 3  ;;  %vm567_vm3 = vcmp.eq.s32.totalorder %v491_v40, 0  ;;  %vm611_vm4 = vcmp.eq.s32.totalorder %v491_v40, 1 }
 0x133   : > { %905 = vpush %v502_v18  ;;  %vm655_vm5 = vcmp.eq.s32.totalorder %v491_v40, 2 }
 0x134   : > { %v935_v48 = vpop.eup %934  ;;  %v544_v62 = vadd.f32 %v543_v45, %v542_v43 }
 0x135   : > { %v599_v50 = vmul.f32 0.6931472, %v935_v48 }
 0x136   : > { %938 = vlog2.f32 %v544_v62 }
 0x137   : > { %v600_v52 = vadd.f32 %v599_v50, %v1165_v22 }
 0x139   : > { %v937_v55 = vpop.eup %936  ;;  %v609_v56 = vsub.f32 %v600_v52, %v608_v53 }
 0x13a   : > { %v643_v59 = vmul.f32 0.6931472, %v937_v55 }
 0x13b   : > { %v610_v63 = vmul.f32 %v609_v56, %v1143_v47 }
 0x13c   : > { %v644_v1 = vadd.f32 %v643_v59, %v1168_v30 }
 0x13d   : > { %v612_v3 = vsel %vm493_vm0, %v610_v63, 0.0 }
 0x13e   : > { %613 = vadd.xlane.f32.xlu1 %v612_v3  ;;  %v653_v4 = vsub.f32 %v644_v1, %v652_v2 }
 0x140   : > { %v654_v7 = vmul.f32 %v653_v4, %v1143_v47 }
 0x142   : > { %v656_v22 = vsel %vm493_vm0, %v654_v7, 0.0 }
 0x143   : > { %v939_v9 = vpop.eup %938  ;;  %657 = vadd.xlane.f32.xlu1 %v656_v22 }
 0x144   : > { %v546_v10 = vmul.f32 0.6931472, %v939_v9 }
 0x146   : > { %v547_v11 = vadd.f32 %v546_v10, %v1171_v33 }
 0x148   : > { %v565_v13 = vsub.f32 %v547_v11, %v564_v12 }
 0x14a   : > { %v566_v30 = vmul.f32 %v565_v13, %v1143_v47 }
 0x14c   : > { %v568_v14 = vsel %vm493_vm0, %v566_v30, 0.0 }
 0x14d   : > { %569 = vadd.xlane.f32.xlu0 %v568_v14 }
 0x164   : > { %s906_s5 = spop %905 }
 0x165   : > { %v504_v41 = vstv %s906_s5 }
 0x166   : > { %v505_v43 = vsel %vm492_vm2, %v504_v41, 0.0 }
 0x1c7   : > { %v614_v19 = vpop.xlane.xlu1 %613 }
 0x1c8   : > { %v615_v21 = vrot.slane %v614_v19, 4 }
 0x1ca   : > { %v616_v33 = vadd.f32 %v615_v21, %v614_v19 }
 0x1cc   : > { %v658_v20 = vpop.xlane.xlu1 %657  ;;  %v617_v24 = vrot.slane %v616_v33, 2 }
 0x1cd   : > { %v659_v23 = vrot.slane %v658_v20, 4 }
 0x1ce   : > { %v618_v28 = vadd.f32 %v617_v24, %v616_v33 }
 0x1cf   : > { %v660_v5 = vadd.f32 %v659_v23, %v658_v20 }
 0x1d0   : > { %v619_v34 = vrot.slane %v618_v28, 1 }
 0x1d1   : > { %v661_v47 = vrot.slane %v660_v5, 2 }
 0x1d2   : > { %v620_v38 = vadd.f32 %v619_v34, %v618_v28 }
 0x1d3   : > { %v662_v29 = vadd.f32 %v661_v47, %v660_v5 }
 0x1d5   : > { %v663_v36 = vrot.slane %v662_v29, 1 }
 0x1d6   : > { %v570_v25 = vpop.xlane.xlu0 %569 }
 0x1d7   : > { %v571_v26 = vrot.slane %v570_v25, 4  ;;  %v664_v39 = vadd.f32 %v663_v36, %v662_v29 }
 0x1d9   : > { %v572_v27 = vadd.f32 %v571_v26, %v570_v25 }
 0x1db   : > { %v573_v31 = vrot.slane %v572_v27, 2 }
 0x1dd   : > { %v574_v32 = vadd.f32 %v573_v31, %v572_v27 }
 0x1df   : > { %v575_v35 = vrot.slane %v574_v32, 1 }
 0x1e1   : > { %v576_v37 = vadd.f32 %v575_v35, %v574_v32 }
 0x1e3   : > { %907 = vpush %v576_v37 }
 0x1e4   : > { %909 = vpush %v620_v38 }
 0x1e5   : > { %911 = vpush %v664_v39 }
 0x214   : > { %s908_s6 = spop %907 }
 0x215   : > { %v578_v42 = vstv %s908_s6  ;;  %s910_s7 = spop %909 }
 0x216   : > { %v579_v44 = vsel %vm567_vm3, %v578_v42, 0.0  ;;  %v622_v45 = vstv %s910_s7  ;;  %s912_s8 = spop %911 }
 0x217   : > { %v580_v46 = vadd.f32 %v579_v44, %v505_v43  ;;  %v666_v48 = vstv %s912_s8  ;;  %v623_v49 = vsel %vm611_vm4, %v622_v45, 0.0 }
 0x218   : > { %v667_v0 = vsel %vm655_vm5, %v666_v48, 0.0 }
 0x219   : > { %v624_v62 = vadd.f32 %v623_v49, %v580_v46 }
 0x21b   : > { %v668_v50 = vadd.f32 %v667_v0, %v624_v62 }
 0x21d   : > { %669 = vst [vmem:[%s241_s11] sm:$0x1] %v668_v50 }
 0x21e PF: > { %s14_s15 = sadd.s32 1, %s946_s15  }
 0x21f   : > { %p11_p4 = scmp.ge.s32.totalorder %s14_s15, 4  }
 0x221   :  { %13 = sbr.rel (!%p11_p4) target bundleno = 1 (0x1), region = 75 }

// kernel: _lambda_.4
= control target key start
LH: loop header
LB: loop body
LE: loop exit
PB: predicated region body
PF: predicated region fallthrough
CT: control target
= control target key end

     0   :  { %v39_v26 = vlaneseq  ;;  %s93_s0 = inlined_call_operand.vmem [shape: f32[8,512], index: 0, kind: input, shape index: {}]   ;;  %s94_s1 = inlined_call_operand.vmem [shape: f32[8,512], index: 1, kind: input, shape index: {}]   ;;  %s95_s2 = inlined_call_operand.vmem [shape: f32[1,1,128], index: 2, kind: output, shape index: {}]  }
   0x1   :  { %v11_v0 = vld [vmem:[%s93_s0] sm:$0xff]  ;;  %v12_v1 = vld [vmem:[%s93_s0 + $0x8] sm:$0xff]  ;;  %v13_v2 = vld [vmem:[%s93_s0 + $0x10] sm:$0xff] }
   0x2   :  { %v14_v3 = vld [vmem:[%s93_s0 + $0x18] sm:$0xff]  ;;  %v15_v4 = vld [vmem:[%s94_s1] sm:$0xff]  ;;  %v16_v5 = vld [vmem:[%s94_s1 + $0x8] sm:$0xff]  ;;  %v40_v27 = vand.u32 127, %v39_v26 }
   0x3   :  { %v17_v6 = vld [vmem:[%s94_s1 + $0x10] sm:$0xff]  ;;  %v18_v7 = vld [vmem:[%s94_s1 + $0x18] sm:$0xff]  ;;  %v19_v8 = vsub.f32 %v11_v0, %v15_v4  ;;  %v20_v9 = vsub.f32 %v12_v1, %v16_v5 }
   0x4   :  { %v21_v10 = vsub.f32 %v13_v2, %v17_v6  ;;  %v22_v11 = vsub.f32 %v14_v3, %v18_v7  ;;  %vm41_vm0 = vcmp.eq.s32.totalorder %v40_v27, 0 }
   0x5   :  { %v23_v12 = vand.u32 2147483647, %v19_v8  ;;  %v24_v13 = vand.u32 2147483647, %v20_v9 }
   0x6   :  { %v25_v14 = vand.u32 2147483647, %v21_v10  ;;  %v26_v15 = vand.u32 2147483647, %v22_v11 }
   0x7   :  { %v27_v16 = vadd.f32 %v24_v13, %v23_v12 }
   0x9   :  { %v28_v17 = vadd.f32 %v27_v16, %v25_v14 }
   0xb   :  { %v29_v18 = vadd.f32 %v28_v17, %v26_v15 }
   0xd   :  { %30 = vadd.xlane.f32.xlu0 %v29_v18 }
  0x96   :  { %v31_v19 = vpop.xlane.xlu0 %30 }
  0x97   :  { %v32_v20 = vrot.slane %v31_v19, 4 }
  0x99   :  { %v33_v21 = vadd.f32 %v32_v20, %v31_v19 }
  0x9b   :  { %v34_v22 = vrot.slane %v33_v21, 2 }
  0x9d   :  { %v35_v23 = vadd.f32 %v34_v22, %v33_v21 }
  0x9f   :  { %v36_v24 = vrot.slane %v35_v23, 1 }
  0xa1   :  { %v37_v25 = vadd.f32 %v36_v24, %v35_v23 }
  0xa3   :  { %49 = vpush %v37_v25 }
  0xd4   :  { %s50_s0 = spop %49 }
  0xd5   :  { %v42_v28 = vstv %s50_s0 }
  0xd6   :  { %v43_v29 = vsel %vm41_vm0, %v42_v28, 0.0 }
  0xd7   :  { %44 = vst [vmem:[%s95_s2] sm:$0x1] %v43_v29 }

// kernel: _lambda_.5
= control target key start
LH: loop header
LB: loop body
LE: loop exit
PB: predicated region body
PF: predicated region fallthrough
CT: control target
= control target key end

     0   :  { %v228_v4 = vmov 0.0   ;;  %s339_s1 = inlined_call_operand.vmem [shape: f32[8,512], index: 1, kind: input, shape index: {}]   ;;  %s340_s0 = inlined_call_operand.vmem [shape: f32[8,512], index: 0, kind: input, shape index: {}]   ;;  %s341_s2 = inlined_call_operand.vmem [shape: f32[1,1,128], index: 2, kind: output, shape index: {}]  }
   0x1   :  { %v247_v0 = vld [vmem:[%s339_s1] sm:$0xff]  ;;  %v252_v1 = vld [vmem:[%s339_s1 + $0x8] sm:$0xff]  ;;  %v257_v2 = vld [vmem:[%s339_s1 + $0x10] sm:$0xff] }
   0x2   :  { %vm51_vm0 = vcmp.eq.f32.partialorder %v247_v0, 1.0  ;;  %vm52_vm1 = vcmp.eq.f32.partialorder %v252_v1, 1.0  ;;  %v264_v3 = vld [vmem:[%s339_s1 + $0x18] sm:$0xff]  ;;  %v11_v7 = vld [vmem:[%s340_s0] sm:$0xff]  ;;  %v12_v8 = vld [vmem:[%s340_s0 + $0x8] sm:$0xff]  ;;  %vm53_vm2 = vcmp.eq.f32.partialorder %v257_v2, 1.0 }
   0x3   :  { %v269_v5 = vsel %vm51_vm0, 1.0, %v228_v4  ;;  %v274_v6 = vsel %vm52_vm1, 1.0, %v228_v4  ;;  %v13_v9 = vld [vmem:[%s340_s0 + $0x10] sm:$0xff]  ;;  %v289_v10 = vsel %vm53_vm2, 1.0, %v228_v4  ;;  %v14_v11 = vld [vmem:[%s340_s0 + $0x18] sm:$0xff]  ;;  %vm54_vm3 = vcmp.eq.f32.partialorder %v264_v3, 1.0 }
   0x4   :  { %v155_v12 = vadd.f32 %v274_v6, %v269_v5  ;;  %v185_v13 = vmul.f32 -1.442695, %v11_v7  ;;  %v186_v14 = vmul.f32 -1.442695, %v12_v8  ;;  %v300_v15 = vsel %vm54_vm3, 1.0, %v228_v4 }
   0x5   :  { %v187_v16 = vmul.f32 -1.442695, %v13_v9  ;;  %v188_v18 = vmul.f32 -1.442695, %v14_v11  ;;  %v91_v36 = vsub.f32 1.0, %v247_v0  ;;  %v92_v40 = vsub.f32 1.0, %v252_v1 }
   0x6   :  { %v156_v17 = vadd.f32 %v289_v10, %v155_v12  ;;  %204 = vpow2.f32 %v185_v13  ;;  %v93_v42 = vsub.f32 1.0, %v257_v2  ;;  %v94_v45 = vsub.f32 1.0, %v264_v3 }
   0x7   :  { %206 = vpow2.f32 %v186_v14  ;;  %v95_v47 = vmul.f32 %v91_v36, %v91_v36  ;;  %v96_v50 = vmul.f32 %v92_v40, %v92_v40  ;;  %vm55_vm4 = vcmp.lt.f32.partialorder %v247_v0, 1.0 }
   0x8   :  { %v157_v19 = vadd.f32 %v300_v15, %v156_v17  ;;  %208 = vpow2.f32 %v187_v16  ;;  %v97_v52 = vmul.f32 %v93_v42, %v93_v42  ;;  %v98_v54 = vmul.f32 %v94_v45, %v94_v45 }
   0x9   :  { %210 = vpow2.f32 %v188_v18  ;;  %v99_v56 = vmul.f32 %v95_v47, %v95_v47  ;;  %v100_v58 = vmul.f32 %v96_v50, %v96_v50  ;;  %vm56_vm5 = vcmp.lt.f32.partialorder %v252_v1, 1.0 }
   0xa   :  { %158 = vadd.xlane.f32.xlu1 %v157_v19  ;;  %v101_v60 = vmul.f32 %v97_v52, %v97_v52  ;;  %v102_v62 = vmul.f32 %v98_v54, %v98_v54  ;;  %vm57_vm6 = vcmp.lt.f32.partialorder %v257_v2, 1.0  ;;  %vm58_vm7 = vcmp.lt.f32.partialorder %v264_v3, 1.0 }
   0xb   :  { %v193_v8 = vsel %vm55_vm4, 1.0, %v228_v4  ;;  %v194_v11 = vsel %vm56_vm5, 1.0, %v228_v4  ;;  %v195_v13 = vsel %vm57_vm6, 1.0, %v228_v4  ;;  %v196_v16 = vsel %vm58_vm7, 1.0, %v228_v4 }
  0x13   :  { %v205_v20 = vpop.eup %204 }
  0x14   :  { %v31_v21 = vadd.f32 1.0, %v205_v20  ;;  %v207_v22 = vpop.eup %206 }
  0x15   :  { %v209_v23 = vpop.eup %208  ;;  %v32_v24 = vadd.f32 1.0, %v207_v22 }
  0x16   :  { %212 = vrcp.f32 %v31_v21  ;;  %v211_v25 = vpop.eup %210  ;;  %v33_v26 = vadd.f32 1.0, %v209_v23 }
  0x17   :  { %v34_v27 = vadd.f32 1.0, %v211_v25  ;;  %214 = vrcp.f32 %v32_v24 }
  0x18   :  { %216 = vrcp.f32 %v33_v26 }
  0x19   :  { %218 = vrcp.f32 %v34_v27 }
  0x23   :  { %v213_v28 = vpop.eup %212 }
  0x24   :  { %v43_v29 = vmax.f32 %v213_v28, 0.0001  ;;  %v215_v30 = vpop.eup %214 }
  0x25   :  { %v217_v31 = vpop.eup %216  ;;  %v44_v32 = vmax.f32 %v215_v30, 0.0001 }
  0x26   :  { %v47_v33 = vmin.f32 %v43_v29, 0.9999  ;;  %v219_v34 = vpop.eup %218  ;;  %v45_v35 = vmax.f32 %v217_v31, 0.0001 }
  0x27   :  { %v46_v37 = vmax.f32 %v219_v34, 0.0001  ;;  %v48_v38 = vmin.f32 %v44_v32, 0.9999 }
  0x28   :  { %v75_v39 = vsub.f32 1.0, %v47_v33  ;;  %v49_v41 = vmin.f32 %v45_v35, 0.9999  ;;  %v87_v57 = vmul.f32 %v47_v33, %v47_v33 }
  0x29   :  { %v50_v43 = vmin.f32 %v46_v37, 0.9999  ;;  %v76_v44 = vsub.f32 1.0, %v48_v38  ;;  %v88_v59 = vmul.f32 %v48_v38, %v48_v38 }
  0x2a   :  { %v77_v46 = vsub.f32 1.0, %v49_v41  ;;  %v79_v49 = vsel %vm51_vm0, %v47_v33, %v75_v39  ;;  %v89_v61 = vmul.f32 %v49_v41, %v49_v41  ;;  %v103_v7 = vmul.f32 %v99_v56, %v87_v57 }
  0x2b   :  { %v78_v48 = vsub.f32 1.0, %v50_v43  ;;  %v80_v51 = vsel %vm52_vm1, %v48_v38, %v76_v44  ;;  %220 = vlog2.f32 %v79_v49  ;;  %v90_v63 = vmul.f32 %v50_v43, %v50_v43 }
  0x2c   :  { %v81_v53 = vsel %vm53_vm2, %v49_v41, %v77_v46  ;;  %222 = vlog2.f32 %v80_v51  ;;  %v104_v9 = vmul.f32 %v100_v58, %v88_v59  ;;  %v105_v12 = vmul.f32 %v101_v60, %v89_v61 }
  0x2d   :  { %v82_v55 = vsel %vm54_vm3, %v50_v43, %v78_v48  ;;  %224 = vlog2.f32 %v81_v53  ;;  %v106_v14 = vmul.f32 %v102_v62, %v90_v63  ;;  %v83_v17 = vmul.f32 %v75_v39, %v75_v39 }
  0x2e   :  { %226 = vlog2.f32 %v82_v55  ;;  %v107_v18 = vmul.f32 %v193_v8, %v103_v7  ;;  %v84_v19 = vmul.f32 %v76_v44, %v76_v44  ;;  %v108_v20 = vmul.f32 %v194_v11, %v104_v9 }
  0x2f   :  { %v85_v21 = vmul.f32 %v77_v46, %v77_v46  ;;  %v109_v22 = vmul.f32 %v195_v13, %v105_v12  ;;  %v86_v23 = vmul.f32 %v78_v48, %v78_v48  ;;  %v110_v24 = vmul.f32 %v196_v16, %v106_v14 }
  0x30   :  { %v111_v26 = vsel %vm51_vm0, %v83_v17, %v107_v18  ;;  %v112_v28 = vsel %vm52_vm1, %v84_v19, %v108_v20  ;;  %v167_v63 = vlaneseq }
  0x31   :  { %v113_v4 = vsel %vm53_vm2, %v85_v21, %v109_v22  ;;  %v114_v33 = vsel %vm54_vm3, %v86_v23, %v110_v24 }
  0x32   :  { %v168_v7 = vand.u32 127, %v167_v63 }
  0x34   :  { %vm169_vm8 = vcmp.eq.s32.totalorder %v168_v7, 0  ;;  %vm172_vm9 = vcmp.eq.s32.totalorder %v168_v7, 1  ;;  %vm176_vm10 = vcmp.eq.s32.totalorder %v168_v7, 2 }
  0x38   :  { %v221_v25 = vpop.eup %220 }
  0x39   :  { %v223_v27 = vpop.eup %222  ;;  %v116_v29 = vmul.f32 0.6931472, %v221_v25 }
  0x3a   :  { %v225_v30 = vpop.eup %224  ;;  %v118_v31 = vmul.f32 0.6931472, %v223_v27 }
  0x3b   :  { %v227_v32 = vpop.eup %226  ;;  %v120_v34 = vmul.f32 0.6931472, %v225_v30  ;;  %v123_v35 = vmul.f32 %v116_v29, %v111_v26 }
  0x3c   :  { %v122_v36 = vmul.f32 0.6931472, %v227_v32  ;;  %v124_v37 = vmul.f32 %v118_v31, %v112_v28 }
  0x3d   :  { %v125_v0 = vmul.f32 %v120_v34, %v113_v4  ;;  %v139_v38 = vmul.f32 %v269_v5, %v123_v35 }
  0x3e   :  { %v126_v39 = vmul.f32 %v122_v36, %v114_v33  ;;  %v140_v1 = vmul.f32 %v274_v6, %v124_v37  ;;  %v127_v40 = vadd.f32 %v124_v37, %v123_v35 }
  0x3f   :  { %v141_v41 = vmul.f32 %v289_v10, %v125_v0 }
  0x40   :  { %v142_v2 = vmul.f32 %v300_v15, %v126_v39  ;;  %v128_v42 = vadd.f32 %v127_v40, %v125_v0  ;;  %v143_v43 = vadd.f32 %v140_v1, %v139_v38 }
  0x42   :  { %v129_v44 = vadd.f32 %v128_v42, %v126_v39  ;;  %v144_v3 = vadd.f32 %v143_v43, %v141_v41 }
  0x44   :  { %130 = vadd.xlane.f32.xlu0 %v129_v44  ;;  %v145_v45 = vadd.f32 %v144_v3, %v142_v2 }
  0x48   :  { %146 = vadd.xlane.f32.xlu0 %v145_v45 }
  0x93   :  { %v159_v46 = vpop.xlane.xlu1 %158 }
  0x94   :  { %v160_v47 = vrot.slane %v159_v46, 4 }
  0x96   :  { %v161_v48 = vadd.f32 %v160_v47, %v159_v46 }
  0x98   :  { %v162_v51 = vrot.slane %v161_v48, 2 }
  0x9a   :  { %v163_v15 = vadd.f32 %v162_v51, %v161_v48 }
  0x9c   :  { %v164_v59 = vrot.slane %v163_v15, 1 }
  0x9e   :  { %v165_v62 = vadd.f32 %v164_v59, %v163_v15 }
  0xcd   :  { %v131_v49 = vpop.xlane.xlu0 %130 }
  0xce   :  { %v132_v5 = vrot.slane %v131_v49, 4 }
  0xd0   :  { %v133_v50 = vadd.f32 %v132_v5, %v131_v49 }
  0xd1   :  { %v147_v6 = vpop.xlane.xlu0 %146 }
  0xd2   :  { %v134_v52 = vrot.slane %v133_v50, 2  ;;  %v148_v53 = vrot.slane %v147_v6, 4 }
  0xd4   :  { %v149_v10 = vadd.f32 %v148_v53, %v147_v6  ;;  %v135_v54 = vadd.f32 %v134_v52, %v133_v50 }
  0xd6   :  { %v150_v55 = vrot.slane %v149_v10, 2  ;;  %v136_v56 = vrot.slane %v135_v54, 1 }
  0xd8   :  { %v151_v57 = vadd.f32 %v150_v55, %v149_v10  ;;  %v137_v58 = vadd.f32 %v136_v56, %v135_v54 }
  0xda   :  { %197 = vpush %v137_v58  ;;  %v152_v60 = vrot.slane %v151_v57, 1 }
  0xdc   :  { %v153_v61 = vadd.f32 %v152_v60, %v151_v57 }
  0xde   :  { %199 = vpush %v153_v61 }
  0xdf   :  { %201 = vpush %v165_v62 }
 0x10b   :  { %s198_s0 = spop %197 }
 0x10c   :  { %v170_v8 = vstv %s198_s0 }
 0x10d   :  { %v171_v11 = vsel %vm169_vm8, %v170_v8, 0.0 }
 0x10f   :  { %s200_s24 = spop %199 }
 0x110   :  { %v173_v9 = vstv %s200_s24  ;;  %s202_s25 = spop %201 }
 0x111   :  { %v174_v12 = vsel %vm172_vm9, %v173_v9, 0.0  ;;  %v177_v13 = vstv %s202_s25 }
 0x112   :  { %v175_v14 = vadd.f32 %v174_v12, %v171_v11  ;;  %v178_v16 = vsel %vm176_vm10, %v177_v13, 0.0 }
 0x114   :  { %v179_v17 = vadd.f32 %v178_v16, %v175_v14 }
 0x116   :  { %180 = vst [vmem:[%s341_s2] sm:$0x1] %v179_v17 }

// kernel: _lambda_.6
= control target key start
LH: loop header
LB: loop body
LE: loop exit
PB: predicated region body
PF: predicated region fallthrough
CT: control target
= control target key end

     0   :  { %s1606_s13 = smov 0   ;;  %s2347_s0 = inlined_call_operand.vmem [shape: s32[2,1,8], index: 0, kind: input, shape index: {}]   ;;  %s2348_s1 = inlined_call_operand.vmem [shape: f32[2,1,8], index: 1, kind: input, shape index: {}]   ;;  %s2349_s2 = inlined_call_operand.vmem [shape: f32[2,3,256], index: 2, kind: input, shape index: {}]   ;;  %s2350_s3 = inlined_call_operand.vmem [shape: f32[2,8,256], index: 3, kind: input, shape index: {}]   ;;  %s2351_s4 = inlined_call_operand.vmem [shape: f32[2,3,256], index: 4, kind: input, shape index: {}]   ;;  %s2352_s5 = inlined_call_operand.vmem [shape: f32[2,2,256], index: 5, kind: input, shape index: {}]   ;;  %s2353_s6 = inlined_call_operand.vmem [shape: f32[2,3,8], index: 6, kind: input, shape index: {}]   ;;  %s2354_s7 = inlined_call_operand.vmem [shape: f32[2,8,8], index: 7, kind: input, shape index: {}]   ;;  %s2355_s8 = inlined_call_operand.vmem [shape: f32[2,3,8], index: 8, kind: input, shape index: {}]   ;;  %s2356_s9 = inlined_call_operand.vmem [shape: f32[2,2,8], index: 9, kind: input, shape index: {}]   ;;  %s2357_s10 = inlined_call_operand.vmem [shape: f32[2,1,128], index: 10, kind: output, shape index: {}]  }
   0x1 LB: > { %s1196_s14 = sadd.s32 4294967295, %s1548_s13   ;;  %p1200_p0 = scmp.ge.s32.totalorder %s1548_s13, 1  ;;  %s1548_s13 = sphi %s1606_s13, %s20_s13  }
   0x2   : > { %p394_p1 = scmp.lt.s32.totalorder %s1548_s13, 3 }
   0x4   : > { %p395_p2 = pnand %p1200_p0, %p394_p1 }
   0x5   : > { %p467_p3 = scmp.lt.s32.totalorder (!%p395_p2), %s1196_s14, 1 }
   0x6   : > { %398 = sbr.rel (%p395_p2) target bundleno = 495 (0x1ef), region = 60 }
   0xb   : > { %v512_v0 = vlaneseq  ;;  %s2407_s14 = smov (!%p467_p3, %s1196_s14), 1  ;;  %v1550_v10 = vmov 1.0  }
   0xc   : > { %s469_s17 = scalar_lea.vmem %s2347_s0, %s2407_s14  ;;  %s1900_s18 = sshll.u32 %s2407_s14, 3 }
   0xd   : > { %v1617_v1 = vshrl.u32 %v512_v0, 7  ;;  %v1635_v6 = vld [vmem:[%s469_s17] ss:$0 sm:$0xff]  ;;  %s477_s21 = scalar_lea.vmem %s2349_s2, %s1900_s18  ;;  %s1378_s22 = sshll.u32 %s2407_s14, 4 }
   0xe   : > { %v663_v35 = vld [vmem:[%s477_s21] sm:$0x77]  ;;  %s482_s25 = scalar_lea.vmem %s2350_s3, %s1378_s22  ;;  %s2210_s26 = sshll.u32 %s2407_s14, 2 }
   0xf   : > { %v1624_v2 = vadd.s32 248, %v1617_v1  ;;  %v1627_v3 = vadd.s32 120, %v1617_v1  ;;  %v1630_v4 = vadd.s32 240, %v1617_v1  ;;  %v1633_v5 = vadd.s32 112, %v1617_v1  ;;  %v763_v37 = vld [vmem:[%s482_s25 + $0x8] sm:$0xff]  ;;  %v762_v38 = vld [vmem:[%s482_s25] sm:$0xff]  ;;  %s487_s29 = scalar_lea.vmem %s2351_s4, %s1900_s18  ;;  %s492_s12 = scalar_lea.vmem %s2352_s5, %s2210_s26 }
  0x10   : > { %v1638_v7 = vadd.s32 232, %v1617_v1  ;;  %v1641_v8 = vadd.s32 104, %v1617_v1  ;;  %v1650_v9 = vadd.s32 224, %v1617_v1  ;;  %v1663_v11 = vadd.s32 96, %v1617_v1  ;;  %828 = vmatprep.mubr.f32.mxu1 %v763_v37  ;;  %v853_v39 = vld [vmem:[%s487_s29] sm:$0x77]  ;;  %s472_s17 = scalar_lea.vmem %s2348_s1, %s2407_s14  ;;  %s496_s21 = scalar_lea.vmem %s2353_s6, %s2210_s26 }
  0x11   : > { %vm581_vm0 = vcmp.eq.s32.totalorder %v1624_v2, %v1635_v6  ;;  %vm565_vm1 = vcmp.eq.s32.totalorder %v1627_v3, %v1635_v6  ;;  %vm580_vm2 = vcmp.eq.s32.totalorder %v1630_v4, %v1635_v6  ;;  %vm564_vm3 = vcmp.eq.s32.totalorder %v1633_v5, %v1635_v6  ;;  %v1342_v40 = vld.sshfl [vmem:[%s492_s12] sm:$0x33 pattern:$0x76325410]  ;;  %s500_s24 = scalar_lea.vmem %s2354_s7, %s1900_s18  ;;  %s1212_s18 = sshll.u32 %s2407_s14, 1 }
  0x12   : > { %1381 = vmatprep.subr.msk.mxu0 %vm581_vm0, %v1550_v10  ;;  %1416 = vmatprep.subr.msk.mxu1 %vm581_vm0, %v1550_v10  ;;  %vm579_vm4 = vcmp.eq.s32.totalorder %v1638_v7, %v1635_v6  ;;  %v1676_v12 = vadd.s32 216, %v1617_v1  ;;  %vm563_vm5 = vcmp.eq.s32.totalorder %v1641_v8, %v1635_v6  ;;  %v1689_v13 = vadd.s32 88, %v1617_v1  ;;  %v646_v43 = vld [vmem:[%s472_s17] sm:$0x1]  ;;  %s504_s28 = scalar_lea.vmem %s2355_s8, %s2210_s26  ;;  %s508_s11 = scalar_lea.vmem %s2356_s9, %s1212_s18 }
  0x13   : > { %1382 = vmatpush3.msk.msra.mxu0 %vm565_vm1, %v1550_v10  ;;  %1417 = vmatpush3.msk.msra.mxu1 %vm565_vm1, %v1550_v10  ;;  %vm578_vm6 = vcmp.eq.s32.totalorder %v1650_v9, %v1635_v6  ;;  %v1702_v14 = vadd.s32 208, %v1617_v1  ;;  %vm562_vm7 = vcmp.eq.s32.totalorder %v1663_v11, %v1635_v6  ;;  %v1715_v15 = vadd.s32 80, %v1617_v1  ;;  %v737_v49 = vld [vmem:[%s496_s21] sm:$0x7]  ;;  %s511_s21 = scalar_lea.vmem %s2357_s10, %s2407_s14 }
  0x14   : > { %1383 = vmatprep.subr.msk.mxu0 %vm580_vm2, %v1550_v10  ;;  %1418 = vmatprep.subr.msk.mxu1 %vm580_vm2, %v1550_v10  ;;  %vm577_vm8 = vcmp.eq.s32.totalorder %v1676_v12, %v1635_v6  ;;  %v1728_v16 = vadd.s32 200, %v1617_v1  ;;  %vm561_vm9 = vcmp.eq.s32.totalorder %v1689_v13, %v1635_v6  ;;  %v1741_v17 = vadd.s32 72, %v1617_v1  ;;  %v834_v51 = vld [vmem:[%s500_s24] sm:$0xff] }
  0x15   : > { %1384 = vmatpush3.msk.msra.mxu0 %vm564_vm3, %v1550_v10  ;;  %1419 = vmatpush3.msk.msra.mxu1 %vm564_vm3, %v1550_v10  ;;  %vm576_vm10 = vcmp.eq.s32.totalorder %v1702_v14, %v1635_v6  ;;  %v1754_v18 = vadd.s32 192, %v1617_v1  ;;  %vm2358_vm11 = vcmp.eq.s32.totalorder %v1715_v15, %v1635_v6  ;;  %v1767_v19 = vadd.s32 64, %v1617_v1  ;;  %v1027_v12 = vld [vmem:[%s508_s11] sm:$0x3] }
  0x16   : > { %1385 = vmatprep.subr.msk.mxu0 %vm579_vm4, %v1550_v10  ;;  %1420 = vmatprep.subr.msk.mxu1 %vm579_vm4, %v1550_v10  ;;  %vm2359_vm12 = vcmp.eq.s32.totalorder %v1728_v16, %v1635_v6  ;;  %v1780_v20 = vadd.s32 184, %v1617_v1  ;;  %vm2361_vm13 = vcmp.eq.s32.totalorder %v1741_v17, %v1635_v6  ;;  %v1793_v21 = vadd.s32 56, %v1617_v1 }
  0x17   : > { %1386 = vmatpush3.msk.msra.mxu0 %vm563_vm5, %v1550_v10  ;;  %1421 = vmatpush3.msk.msra.mxu1 %vm563_vm5, %v1550_v10  ;;  %vm2360_vm14 = vcmp.eq.s32.totalorder %v1754_v18, %v1635_v6  ;;  %v1806_v22 = vadd.s32 176, %v1617_v1  ;;  %vm2362_vm15 = vcmp.eq.s32.totalorder %v1767_v19, %v1635_v6  ;;  %v1819_v23 = vadd.s32 48, %v1617_v1 }
  0x18   : > { %1387 = vmatprep.subr.msk.mxu0 %vm578_vm6, %v1550_v10  ;;  %1422 = vmatprep.subr.msk.mxu1 %vm578_vm6, %v1550_v10  ;;  %v1832_v24 = vadd.s32 168, %v1617_v1  ;;  %v1845_v25 = vadd.s32 40, %v1617_v1  ;;  %v1858_v26 = vadd.s32 160, %v1617_v1  ;;  %v1871_v27 = vadd.s32 32, %v1617_v1 }
  0x19   : > { %1388 = vmatpush3.msk.msra.mxu0 %vm562_vm7, %v1550_v10  ;;  %1423 = vmatpush3.msk.msra.mxu1 %vm562_vm7, %v1550_v10  ;;  %v1884_v28 = vadd.s32 152, %v1617_v1  ;;  %v1897_v29 = vadd.s32 24, %v1617_v1  ;;  %v1913_v30 = vadd.s32 144, %v1617_v1  ;;  %v1926_v31 = vadd.s32 16, %v1617_v1 }
  0x1a   : > { %1389 = vmatprep.subr.msk.mxu0 %vm577_vm8, %v1550_v10  ;;  %1424 = vmatprep.subr.msk.mxu1 %vm577_vm8, %v1550_v10  ;;  %v1939_v32 = vadd.s32 136, %v1617_v1  ;;  %v1956_v33 = vadd.s32 8, %v1617_v1  ;;  %v1969_v34 = vadd.s32 128, %v1617_v1  ;;  %v665_v36 = vcombine.high %v663_v35, %v663_v35 }
  0x1b   : > { %1390 = vmatpush3.msk.msra.mxu0 %vm561_vm9, %v1550_v10  ;;  %1425 = vmatpush3.msk.msra.mxu1 %vm561_vm9, %v1550_v10  ;;  %v855_v41 = vcombine.high %v853_v39, %v853_v39  ;;  %v954_v42 = vcombine.high %v1342_v40, %v1342_v40  ;;  %v743_v47 = vsub.s32 0, %v1617_v1 }
  0x1c   : > { %1391 = vmatprep.subr.msk.mxu0 %vm576_vm10, %v1550_v10  ;;  %1426 = vmatprep.subr.msk.mxu1 %vm576_vm10, %v1550_v10 }
  0x1d   : > { %1392 = vmatpush3.msk.msra.mxu0 %vm2358_vm11, %v1550_v10  ;;  %1427 = vmatpush3.msk.msra.mxu1 %vm2358_vm11, %v1550_v10  ;;  %vm2363_vm11 = vcmp.eq.s32.totalorder %v1780_v20, %v1635_v6  ;;  %v744_v56 = vrot.slane %v646_v43, %v743_v47 }
  0x1e   : > { %1393 = vmatprep.subr.msk.mxu0 %vm2359_vm12, %v1550_v10  ;;  %1428 = vmatprep.subr.msk.mxu1 %vm2359_vm12, %v1550_v10  ;;  %vm2368_vm12 = vcmp.eq.s32.totalorder %v1793_v21, %v1635_v6 }
  0x1f   : > { %1394 = vmatpush3.msk.msra.mxu0 %vm2361_vm13, %v1550_v10  ;;  %1429 = vmatpush3.msk.msra.mxu1 %vm2361_vm13, %v1550_v10  ;;  %vm2365_vm13 = vcmp.eq.s32.totalorder %v1819_v23, %v1635_v6 }
  0x20   : > { %1395 = vmatprep.subr.msk.mxu0 %vm2360_vm14, %v1550_v10  ;;  %1430 = vmatprep.subr.msk.mxu1 %vm2360_vm14, %v1550_v10  ;;  %vm2364_vm14 = vcmp.eq.s32.totalorder %v1806_v22, %v1635_v6 }
  0x21   : > { %1396 = vmatpush3.msk.msra.mxu0 %vm2362_vm15, %v1550_v10  ;;  %1431 = vmatpush3.msk.msra.mxu1 %vm2362_vm15, %v1550_v10  ;;  %vm2366_vm15 = vcmp.eq.s32.totalorder %v1832_v24, %v1635_v6 }
  0x22   : > { %1397 = vmatprep.subr.msk.mxu0 %vm2363_vm11, %v1550_v10  ;;  %1432 = vmatprep.subr.msk.mxu1 %vm2363_vm11, %v1550_v10  ;;  %vm2367_vm11 = vcmp.eq.s32.totalorder %v1845_v25, %v1635_v6 }
  0x23   : > { %1398 = vmatpush3.msk.msra.mxu0 %vm2368_vm12, %v1550_v10  ;;  %1433 = vmatpush3.msk.msra.mxu1 %vm2368_vm12, %v1550_v10  ;;  %vm2372_vm12 = vcmp.eq.s32.totalorder %v1913_v30, %v1635_v6 }
  0x24   : > { %1399 = vmatprep.subr.msk.mxu0 %vm2364_vm14, %v1550_v10  ;;  %1434 = vmatprep.subr.msk.mxu1 %vm2364_vm14, %v1550_v10  ;;  %vm2370_vm14 = vcmp.eq.s32.totalorder %v1858_v26, %v1635_v6 }
  0x25   : > { %1400 = vmatpush3.msk.msra.mxu0 %vm2365_vm13, %v1550_v10  ;;  %1435 = vmatpush3.msk.msra.mxu1 %vm2365_vm13, %v1550_v10  ;;  %vm2369_vm13 = vcmp.eq.s32.totalorder %v1871_v27, %v1635_v6 }
  0x26   : > { %1401 = vmatprep.subr.msk.mxu0 %vm2366_vm15, %v1550_v10  ;;  %1436 = vmatprep.subr.msk.mxu1 %vm2366_vm15, %v1550_v10  ;;  %vm2371_vm15 = vcmp.eq.s32.totalorder %v1884_v28, %v1635_v6 }
  0x27   : > { %1402 = vmatpush3.msk.msra.mxu0 %vm2367_vm11, %v1550_v10  ;;  %1437 = vmatpush3.msk.msra.mxu1 %vm2367_vm11, %v1550_v10  ;;  %vm2373_vm11 = vcmp.eq.s32.totalorder %v1897_v29, %v1635_v6 }
  0x28   : > { %1403 = vmatprep.subr.msk.mxu0 %vm2370_vm14, %v1550_v10  ;;  %1438 = vmatprep.subr.msk.mxu1 %vm2370_vm14, %v1550_v10  ;;  %vm567_vm14 = vcmp.eq.s32.totalorder %v1939_v32, %v1635_v6 }
  0x29   : > { %1404 = vmatpush3.msk.msra.mxu0 %vm2369_vm13, %v1550_v10  ;;  %1439 = vmatpush3.msk.msra.mxu1 %vm2369_vm13, %v1550_v10  ;;  %vm552_vm13 = vcmp.eq.s32.totalorder %v1926_v31, %v1635_v6 }
  0x2a   : > { %1405 = vmatprep.subr.msk.mxu0 %vm2371_vm15, %v1550_v10  ;;  %1440 = vmatprep.subr.msk.mxu1 %vm2371_vm15, %v1550_v10  ;;  %vm551_vm15 = vcmp.eq.s32.totalorder %v1956_v33, %v1635_v6 }
  0x2b   : > { %1406 = vmatpush3.msk.msra.mxu0 %vm2373_vm11, %v1550_v10  ;;  %1441 = vmatpush3.msk.msra.mxu1 %vm2373_vm11, %v1550_v10  ;;  %vm550_vm11 = vcmp.eq.s32.totalorder %v1617_v1, %v1635_v6 }
  0x2c   : > { %1407 = vmatprep.subr.msk.mxu0 %vm2372_vm12, %v1550_v10  ;;  %1442 = vmatprep.subr.msk.mxu1 %vm2372_vm12, %v1550_v10  ;;  %vm566_vm12 = vcmp.eq.s32.totalorder %v1969_v34, %v1635_v6 }
  0x2d   : > { %1408 = vmatpush3.msk.msra.mxu0 %vm552_vm13, %v1550_v10  ;;  %1443 = vmatpush3.msk.msra.mxu1 %vm552_vm13, %v1550_v10 }
  0x2e   : > { %1409 = vmatprep.subr.msk.mxu0 %vm567_vm14, %v1550_v10  ;;  %1444 = vmatprep.subr.msk.mxu1 %vm567_vm14, %v1550_v10 }
  0x2f   : > { %1410 = vmatpush3.msk.msra.mxu0 %vm551_vm15, %v1550_v10  ;;  %1445 = vmatpush3.msk.msra.mxu1 %vm551_vm15, %v1550_v10 }
  0x30   : > { %1411 = vmatprep.subr.msk.mxu0 %vm566_vm12, %v1550_v10  ;;  %1446 = vmatprep.subr.msk.mxu1 %vm566_vm12, %v1550_v10 }
  0x31   : > { %1412 = vmatpush3.msk.msra.mxu0 %vm550_vm11, %v1550_v10  ;;  %731 = vmatprep.mubr.f32.mxu0 %v665_v36 }
  0x32   : > { %1447 = vmatpush3.msk.msra.mxu1 %vm550_vm11, %v1550_v10  ;;  %732 = vmatmul.mubr.f32.vlgmr.msra.gmra.mxu0 %v663_v35 }
  0x33   : > { %829 = vmatmul.mubr.f32.vlgmr.msra.gmra.mxu1 %v762_v38  ;;  %1451 = vmatprep.subr.msk.mxu0 %vm581_vm0, %v1550_v10 }
  0x34   : > { %1486 = vmatprep.subr.msk.mxu1 %vm581_vm0, %v1550_v10  ;;  %1452 = vmatpush3.msk.msra.mxu0 %vm565_vm1, %v1550_v10  ;;  %vm2374_vm0 = vcmp.eq.s32.totalorder %v1715_v15, %v1635_v6 }
  0x35   : > { %1487 = vmatpush3.msk.msra.mxu1 %vm565_vm1, %v1550_v10  ;;  %1453 = vmatprep.subr.msk.mxu0 %vm580_vm2, %v1550_v10  ;;  %vm2375_vm1 = vmmov %vm2374_vm0 }
  0x36   : > { %1488 = vmatprep.subr.msk.mxu1 %vm580_vm2, %v1550_v10  ;;  %1454 = vmatpush3.msk.msra.mxu0 %vm564_vm3, %v1550_v10  ;;  %vm2376_vm2 = vcmp.eq.s32.totalorder %v1728_v16, %v1635_v6 }
  0x37   : > { %1489 = vmatpush3.msk.msra.mxu1 %vm564_vm3, %v1550_v10  ;;  %1455 = vmatprep.subr.msk.mxu0 %vm579_vm4, %v1550_v10  ;;  %vm2377_vm3 = vmmov %vm2376_vm2 }
  0x38   : > { %1490 = vmatprep.subr.msk.mxu1 %vm579_vm4, %v1550_v10  ;;  %1456 = vmatpush3.msk.msra.mxu0 %vm563_vm5, %v1550_v10  ;;  %vm2378_vm4 = vcmp.eq.s32.totalorder %v1741_v17, %v1635_v6 }
  0x39   : > { %1491 = vmatpush3.msk.msra.mxu1 %vm563_vm5, %v1550_v10  ;;  %1457 = vmatprep.subr.msk.mxu0 %vm578_vm6, %v1550_v10  ;;  %vm2379_vm5 = vmmov %vm2378_vm4 }
  0x3a   : > { %1492 = vmatprep.subr.msk.mxu1 %vm578_vm6, %v1550_v10  ;;  %1458 = vmatpush3.msk.msra.mxu0 %vm562_vm7, %v1550_v10  ;;  %vm2380_vm6 = vcmp.eq.s32.totalorder %v1754_v18, %v1635_v6 }
  0x3b   : > { %1493 = vmatpush3.msk.msra.mxu1 %vm562_vm7, %v1550_v10  ;;  %1459 = vmatprep.subr.msk.mxu0 %vm577_vm8, %v1550_v10  ;;  %vm2381_vm7 = vmmov %vm2380_vm6 }
  0x3c   : > { %1494 = vmatprep.subr.msk.mxu1 %vm577_vm8, %v1550_v10  ;;  %1460 = vmatpush3.msk.msra.mxu0 %vm561_vm9, %v1550_v10  ;;  %vm2382_vm8 = vcmp.eq.s32.totalorder %v1767_v19, %v1635_v6 }
  0x3d   : > { %1495 = vmatpush3.msk.msra.mxu1 %vm561_vm9, %v1550_v10  ;;  %1461 = vmatprep.subr.msk.mxu0 %vm576_vm10, %v1550_v10  ;;  %vm2383_vm9 = vmmov %vm2382_vm8 }
  0x3e   : > { %1496 = vmatprep.subr.msk.mxu1 %vm576_vm10, %v1550_v10  ;;  %1462 = vmatpush3.msk.msra.mxu0 %vm2374_vm0, %v1550_v10  ;;  %vm2384_vm10 = vcmp.eq.s32.totalorder %v1780_v20, %v1635_v6 }
  0x3f   : > { %1497 = vmatpush3.msk.msra.mxu1 %vm2375_vm1, %v1550_v10  ;;  %1463 = vmatprep.subr.msk.mxu0 %vm2376_vm2, %v1550_v10  ;;  %vm2385_vm0 = vmmov %vm2384_vm10  ;;  %vm2386_vm1 = vcmp.eq.s32.totalorder %v1793_v21, %v1635_v6 }
  0x40   : > { %1498 = vmatprep.subr.msk.mxu1 %vm2377_vm3, %v1550_v10  ;;  %1464 = vmatpush3.msk.msra.mxu0 %vm2378_vm4, %v1550_v10  ;;  %vm2387_vm2 = vmmov %vm2386_vm1  ;;  %vm2388_vm3 = vcmp.eq.s32.totalorder %v1806_v22, %v1635_v6 }
  0x41   : > { %1499 = vmatpush3.msk.msra.mxu1 %vm2379_vm5, %v1550_v10  ;;  %1465 = vmatprep.subr.msk.mxu0 %vm2380_vm6, %v1550_v10  ;;  %vm2389_vm4 = vmmov %vm2388_vm3  ;;  %vm2390_vm5 = vcmp.eq.s32.totalorder %v1819_v23, %v1635_v6 }
  0x42   : > { %1500 = vmatprep.subr.msk.mxu1 %vm2381_vm7, %v1550_v10  ;;  %1466 = vmatpush3.msk.msra.mxu0 %vm2382_vm8, %v1550_v10  ;;  %vm2391_vm6 = vmmov %vm2390_vm5  ;;  %vm2392_vm7 = vcmp.eq.s32.totalorder %v1832_v24, %v1635_v6 }
  0x43   : > { %1501 = vmatpush3.msk.msra.mxu1 %vm2383_vm9, %v1550_v10  ;;  %1467 = vmatprep.subr.msk.mxu0 %vm2384_vm10, %v1550_v10  ;;  %vm2393_vm8 = vmmov %vm2392_vm7  ;;  %vm2394_vm9 = vcmp.eq.s32.totalorder %v1845_v25, %v1635_v6 }
  0x44   : > { %1502 = vmatprep.subr.msk.mxu1 %vm2385_vm0, %v1550_v10  ;;  %1468 = vmatpush3.msk.msra.mxu0 %vm2386_vm1, %v1550_v10  ;;  %vm2395_vm10 = vmmov %vm2394_vm9  ;;  %vm2396_vm0 = vcmp.eq.s32.totalorder %v1858_v26, %v1635_v6 }
  0x45   : > { %1503 = vmatpush3.msk.msra.mxu1 %vm2387_vm2, %v1550_v10  ;;  %1469 = vmatprep.subr.msk.mxu0 %vm2388_vm3, %v1550_v10  ;;  %vm2397_vm1 = vmmov %vm2396_vm0  ;;  %vm2398_vm2 = vcmp.eq.s32.totalorder %v1871_v27, %v1635_v6 }
  0x46   : > { %1504 = vmatprep.subr.msk.mxu1 %vm2389_vm4, %v1550_v10  ;;  %1470 = vmatpush3.msk.msra.mxu0 %vm2390_vm5, %v1550_v10  ;;  %vm2399_vm3 = vmmov %vm2398_vm2  ;;  %vm2400_vm4 = vcmp.eq.s32.totalorder %v1884_v28, %v1635_v6 }
  0x47   : > { %1505 = vmatpush3.msk.msra.mxu1 %vm2391_vm6, %v1550_v10  ;;  %1471 = vmatprep.subr.msk.mxu0 %vm2392_vm7, %v1550_v10  ;;  %vm2401_vm5 = vmmov %vm2400_vm4  ;;  %vm2402_vm6 = vcmp.eq.s32.totalorder %v1897_v29, %v1635_v6 }
  0x48   : > { %1506 = vmatprep.subr.msk.mxu1 %vm2393_vm8, %v1550_v10  ;;  %1472 = vmatpush3.msk.msra.mxu0 %vm2394_vm9, %v1550_v10  ;;  %vm2403_vm7 = vmmov %vm2402_vm6  ;;  %vm2404_vm8 = vcmp.eq.s32.totalorder %v1913_v30, %v1635_v6 }
  0x49   : > { %1507 = vmatpush3.msk.msra.mxu1 %vm2395_vm10, %v1550_v10  ;;  %1473 = vmatprep.subr.msk.mxu0 %vm2396_vm0, %v1550_v10  ;;  %vm2405_vm9 = vmmov %vm2404_vm8 }
  0x4a   : > { %1508 = vmatprep.subr.msk.mxu1 %vm2397_vm1, %v1550_v10  ;;  %1474 = vmatpush3.msk.msra.mxu0 %vm2398_vm2, %v1550_v10 }
  0x4b   : > { %1509 = vmatpush3.msk.msra.mxu1 %vm2399_vm3, %v1550_v10  ;;  %1475 = vmatprep.subr.msk.mxu0 %vm2400_vm4, %v1550_v10 }
  0x4c   : > { %1510 = vmatprep.subr.msk.mxu1 %vm2401_vm5, %v1550_v10  ;;  %1476 = vmatpush3.msk.msra.mxu0 %vm2402_vm6, %v1550_v10 }
  0x4d   : > { %1511 = vmatpush3.msk.msra.mxu1 %vm2403_vm7, %v1550_v10  ;;  %1477 = vmatprep.subr.msk.mxu0 %vm2404_vm8, %v1550_v10 }
  0x4e   : > { %1512 = vmatprep.subr.msk.mxu1 %vm2405_vm9, %v1550_v10  ;;  %1478 = vmatpush3.msk.msra.mxu0 %vm552_vm13, %v1550_v10 }
  0x4f   : > { %1513 = vmatpush3.msk.msra.mxu1 %vm552_vm13, %v1550_v10  ;;  %1479 = vmatprep.subr.msk.mxu0 %vm567_vm14, %v1550_v10  ;;  %vm650_vm13 = vcmask 57344  }
  0x50   : > { %1514 = vmatprep.subr.msk.mxu1 %vm567_vm14, %v1550_v10  ;;  %1480 = vmatpush3.msk.msra.mxu0 %vm551_vm15, %v1550_v10  ;;  %v651_v44 = vsel %vm650_vm13, %v646_v43, 0.0  ;;  %vm1032_vm14 = vcmask 58368  }
  0x51   : > { %1515 = vmatpush3.msk.msra.mxu1 %vm551_vm15, %v1550_v10  ;;  %1481 = vmatprep.subr.msk.mxu0 %vm566_vm12, %v1550_v10 }
  0x52   : > { %1516 = vmatprep.subr.msk.mxu1 %vm566_vm12, %v1550_v10  ;;  %1482 = vmatpush3.msk.msra.mxu0 %vm550_vm11, %v1550_v10  ;;  %vm748_vm12 = vcmask 59392  }
  0x53   : > { %921 = vmatprep.mubr.f32.mxu0 %v855_v41  ;;  %1517 = vmatpush3.msk.msra.mxu1 %vm550_vm11, %v1550_v10  ;;  %vm839_vm11 = vcmask 64512   ;;  %v927_v10 = vld [vmem:[%s504_s28] sm:$0x7] }
  0x54   : > { %1021 = vmatprep.mubr.f32.mxu1 %v954_v42  ;;  %922 = vmatmul.mubr.f32.vlgmr.msra.gmra.mxu0 %v853_v39 }
  0x55   : > { %1022 = vmatmul.mubr.f32.vlgmr.msra.gmra.mxu1 %v1342_v40  ;;  %652 = vadd.xlane.f32.xlu0 %v651_v44 }
  0xde   : > { %v653_v63 = vpop.xlane.xlu0 %652 }
  0xdf   : > { %v654_v1 = vrot.slane %v653_v63, 4 }
  0xe1   : > { %v655_v2 = vadd.f32 %v654_v1, %v653_v63 }
  0xe3   : > { %v656_v3 = vrot.slane %v655_v2, 2 }
  0xe5   : > { %v657_v4 = vadd.f32 %v656_v3, %v655_v2 }
  0xe7   : > { %v658_v5 = vrot.slane %v657_v4, 1 }
  0xe9   : > { %v659_v6 = vadd.f32 %v658_v5, %v657_v4 }
  0xeb   : > { %1521 = vpush %v659_v6 }
  0xf2   : > { %v1413_v45 = vpop.f32.mrf.mxu0 }
  0xf3   : > { %v1448_v46 = vpop.f32.mrf.mxu1 }
  0xf4   : > { %v1414_v48 = vpop.f32.mrf.mxu0 }
  0xf5   : > { %v1449_v50 = vpop.f32.mrf.mxu1  ;;  %v1415_v52 = vadd.f32 %v1414_v48, %v1413_v45 }
  0xf6   : > { %v1450_v53 = vadd.f32 %v1449_v50, %v1448_v46 }
  0xf7   : > { %v738_v54 = vsub.f32 %v1415_v52, %v737_v49 }
  0xf8   : > { %v835_v55 = vsub.f32 %v1450_v53, %v834_v51  ;;  %v648_v51 = vand.u32 127, %v512_v0 }
  0xf9   : > { %v739_v57 = vand.u32 2147483647, %v738_v54 }
  0xfa   : > { %v836_v58 = vand.u32 2147483647, %v835_v55  ;;  %vm649_vm15 = vcmp.eq.s32.totalorder %v648_v51, 4  ;;  %vm747_vm10 = vcmp.eq.s32.totalorder %v648_v51, 0  ;;  %vm838_vm0 = vcmp.eq.s32.totalorder %v648_v51, 1 }
  0xfb   : > { %v746_v60 = vmul.f32 %v744_v56, %v739_v57  ;;  %vm931_vm1 = vcmp.eq.s32.totalorder %v648_v51, 2  ;;  %vm1031_vm2 = vcmp.eq.s32.totalorder %v648_v51, 3 }
  0xfc   : > { %v837_v59 = vmul.f32 %v836_v58, %v744_v56 }
  0xfd   : > { %v749_v62 = vsel %vm748_vm12, %v746_v60, 0.0 }
  0xfe   : > { %v840_v61 = vsel %vm839_vm11, %v837_v59, 0.0  ;;  %750 = vadd.xlane.f32.xlu0 %v749_v62 }
  0xff   : > { %841 = vadd.xlane.f32.xlu1 %v840_v61 }
 0x114   : > { %v1483_v7 = vpop.f32.mrf.mxu0 }
 0x115   : > { %v1518_v8 = vpop.f32.mrf.mxu1 }
 0x116   : > { %v1484_v9 = vpop.f32.mrf.mxu0 }
 0x117   : > { %v1519_v11 = vpop.f32.mrf.mxu1  ;;  %v1485_v13 = vadd.f32 %v1484_v9, %v1483_v7 }
 0x118   : > { %v1520_v14 = vadd.f32 %v1519_v11, %v1518_v8 }
 0x119   : > { %v928_v15 = vsub.f32 %v1485_v13, %v927_v10 }
 0x11a   : > { %v1028_v16 = vsub.f32 %v1520_v14, %v1027_v12 }
 0x11b   : > { %v929_v17 = vand.u32 2147483647, %v928_v15 }
 0x11c   : > { %v1029_v18 = vand.u32 2147483647, %v1028_v16  ;;  %s1522_s26 = spop %1521 }
 0x11d   : > { %v930_v19 = vmul.f32 %v929_v17, %v744_v56  ;;  %v661_v52 = vstv %s1522_s26 }
 0x11e   : > { %v1030_v20 = vmul.f32 %v1029_v18, %v744_v56  ;;  %v662_v54 = vsel %vm649_vm15, %v661_v52, 0.0 }
 0x11f   : > { %v932_v21 = vsel %vm748_vm12, %v930_v19, 0.0 }
 0x120   : > { %v1033_v22 = vsel %vm1032_vm14, %v1030_v20, 0.0  ;;  %933 = vadd.xlane.f32.xlu1 %v932_v21 }
 0x121   : > { %1034 = vadd.xlane.f32.xlu0 %v1033_v22 }
 0x187   : > { %v751_v24 = vpop.xlane.xlu0 %750 }
 0x188   : > { %v842_v23 = vpop.xlane.xlu1 %841  ;;  %v752_v26 = vrot.slane %v751_v24, 4 }
 0x189   : > { %v843_v25 = vrot.slane %v842_v23, 4 }
 0x18a   : > { %v753_v28 = vadd.f32 %v752_v26, %v751_v24 }
 0x18b   : > { %v844_v27 = vadd.f32 %v843_v25, %v842_v23 }
 0x18c   : > { %v754_v30 = vrot.slane %v753_v28, 2 }
 0x18d   : > { %v845_v29 = vrot.slane %v844_v27, 2 }
 0x18e   : > { %v755_v31 = vadd.f32 %v754_v30, %v753_v28 }
 0x18f   : > { %v846_v32 = vadd.f32 %v845_v29, %v844_v27 }
 0x190   : > { %v756_v33 = vrot.slane %v755_v31, 1 }
 0x191   : > { %v847_v34 = vrot.slane %v846_v32, 1 }
 0x192   : > { %v757_v35 = vadd.f32 %v756_v33, %v755_v31 }
 0x193   : > { %v848_v36 = vadd.f32 %v847_v34, %v846_v32 }
 0x194   : > { %1523 = vpush %v757_v35 }
 0x195   : > { %1525 = vpush %v848_v36 }
 0x1a9   : > { %v934_v37 = vpop.xlane.xlu1 %933 }
 0x1aa   : > { %v1035_v38 = vpop.xlane.xlu0 %1034  ;;  %v935_v39 = vrot.slane %v934_v37, 4 }
 0x1ab   : > { %v1036_v40 = vrot.slane %v1035_v38, 4 }
 0x1ac   : > { %v936_v41 = vadd.f32 %v935_v39, %v934_v37 }
 0x1ad   : > { %v1037_v42 = vadd.f32 %v1036_v40, %v1035_v38 }
 0x1ae   : > { %v937_v43 = vrot.slane %v936_v41, 2 }
 0x1af   : > { %v1038_v44 = vrot.slane %v1037_v42, 2 }
 0x1b0   : > { %v938_v45 = vadd.f32 %v937_v43, %v936_v41 }
 0x1b1   : > { %v1039_v46 = vadd.f32 %v1038_v44, %v1037_v42 }
 0x1b2   : > { %v939_v47 = vrot.slane %v938_v45, 1 }
 0x1b3   : > { %v1040_v48 = vrot.slane %v1039_v46, 1 }
 0x1b4   : > { %v940_v49 = vadd.f32 %v939_v47, %v938_v45 }
 0x1b5   : > { %v1041_v50 = vadd.f32 %v1040_v48, %v1039_v46 }
 0x1b6   : > { %1527 = vpush %v940_v49 }
 0x1b7   : > { %1529 = vpush %v1041_v50 }
 0x1c5   : > { %s1524_s12 = spop %1523 }
 0x1c6   : > { %v759_v53 = vstv %s1524_s12  ;;  %s1526_s15 = spop %1525 }
 0x1c7   : > { %v760_v55 = vsel %vm747_vm10, %v759_v53, 0.0  ;;  %v850_v57 = vstv %s1526_s15 }
 0x1c8   : > { %v761_v56 = vadd.f32 %v760_v55, %v662_v54  ;;  %v851_v58 = vsel %vm838_vm0, %v850_v57, 0.0 }
 0x1ca   : > { %v852_v59 = vadd.f32 %v851_v58, %v761_v56 }
 0x1e7   : > { %s1528_s16 = spop %1527 }
 0x1e8   : > { %v942_v60 = vstv %s1528_s16  ;;  %s1530_s17 = spop %1529 }
 0x1e9   : > { %v943_v0 = vsel %vm931_vm1, %v942_v60, 0.0  ;;  %v1043_v61 = vstv %s1530_s17 }
 0x1ea   : > { %v944_v62 = vadd.f32 %v943_v0, %v852_v59  ;;  %v1044_v63 = vsel %vm1031_vm2, %v1043_v61, 0.0 }
 0x1ec   : > { %v1045_v1 = vadd.f32 %v1044_v63, %v944_v62 }
 0x1ee   : > { %1046 = vst [vmem:[%s511_s21] sm:$0x1] %v1045_v1 }
 0x1ef PF: > { %s20_s13 = sadd.s32 1, %s1548_s13  }
 0x1f0   : > { %p17_p4 = scmp.ge.s32.totalorder %s20_s13, 4  }
 0x1f2   :  { %19 = sbr.rel (!%p17_p4) target bundleno = 1 (0x1), region = 117 }

</bundles_post_ra>
